<compile_context>
chip_gen: v5e
topology: v5e:2x2
jax: 0.10.0
libtpu: 0.0.40
codegen_flags: <defaults>
</compile_context>

<pallas_src>
import math

import jax
import jax.numpy as jnp
from jax.experimental import pallas as pl
from jax.experimental.pallas import tpu as pltpu

NUM_HEADS = 4


# -----------------------------------------------------------------------------
# Fused kernel: whole batch, 2-layer LSTM recurrence + 4-head self-attention.
# -----------------------------------------------------------------------------
def encoder_kernel(x_ref, w_ref, b_ref, out_ref):
    B, S, Din = x_ref.shape
    H = w_ref.shape[1] // 4
    hd = H // NUM_HEADS

    # ---- unpack packed params once (sublane-aligned ref slices + value lane
    # slices); gate columns are pre-permuted to [i, f, o, g] ------------------
    wih0 = w_ref[0:Din, :]                       # (Din, 4H)
    whh0 = w_ref[Din:Din + H, :]                 # (H, 4H)
    w1ih = w_ref[Din + H:Din + 2 * H, :]         # (H, 4H)
    w1hh = w_ref[Din + 2 * H:Din + 3 * H, :]     # (H, 4H)
    wa = w_ref[Din + 3 * H:Din + 4 * H, :]       # (H, 4H) = [win | wout]
    win = wa[:, :3 * H]                          # (H, 3H), q-block pre-scaled
    wout = wa[:, 3 * H:]                         # (H, H)

    ball = b_ref[...]                            # (3, 4H)
    b0 = ball[0:1, :]                            # (1, 4H)
    b1 = ball[1:2, :]                            # (1, 4H)
    bin_ = ball[2:3, :3 * H]                     # (1, 3H), q-block pre-scaled
    bout = ball[2:3, 3 * H:]                     # (1, H)

    # ---- hoisted layer-0 input projection for the whole batch --------------
    # seq-major rows (t*B + b) so each timestep is a contiguous static slice.
    x_sb = jnp.transpose(x_ref[...], (1, 0, 2)).reshape(S * B, Din)
    xw0 = jnp.dot(x_sb, wih0, preferred_element_type=jnp.float32) + b0   # (S*B,4H)

    h0 = jnp.zeros((B, H), jnp.float32)
    c0 = jnp.zeros((B, H), jnp.float32)
    h1 = jnp.zeros((B, H), jnp.float32)
    c1 = jnp.zeros((B, H), jnp.float32)

    def gates(g):
        # gate order [i, f, o, g]: one sigmoid over (B,3H), one tanh over (B,H)
        sg = jax.nn.sigmoid(g[:, :3 * H])
        return (sg[:, 0 * H:1 * H], sg[:, 1 * H:2 * H], sg[:, 2 * H:3 * H],
                jnp.tanh(g[:, 3 * H:]))

    # S is small & static -> full unroll (keep static only while S stays small;
    # switch to lax.fori_loop(unroll=4/8) + pl.ds if S grows past ~64).
    hs = []
    for t in range(S):
        g0 = xw0[t * B:(t + 1) * B, :] + jnp.dot(
            h0, whh0, preferred_element_type=jnp.float32)
        i0, f0, o0, gg0 = gates(g0)
        c0 = f0 * c0 + i0 * gg0
        h0 = o0 * jnp.tanh(c0)

        # two separate dots (no lane-concat); the h1 dot depends only on the
        # previous timestep so it overlaps layer-0's nonlinearity chain.
        g1 = (jnp.dot(h0, w1ih, preferred_element_type=jnp.float32)
              + jnp.dot(h1, w1hh, preferred_element_type=jnp.float32) + b1)
        i1, f1, o1, gg1 = gates(g1)
        c1 = f1 * c1 + i1 * gg1
        h1 = o1 * jnp.tanh(c1)
        hs.append(h1)                                     # (B, H)

    # lstm_out stacked in registers (no VMEM scratch round trip), seq-major.
    lstm_sb = jnp.concatenate(hs, axis=0)                 # (S*B, H)

    # ---------------- 4-head self-attention ---------------------------------
    qkv = jnp.dot(lstm_sb, win, preferred_element_type=jnp.float32) + bin_
    qkv = jnp.transpose(qkv.reshape(S, B, 3 * H), (1, 0, 2))   # (B, S, 3H)

    ctxs = []
    w_sum = jnp.zeros((B, S, S), jnp.float32)
    for h in range(NUM_HEADS):
        qh = qkv[:, :, 0 * H + h * hd:0 * H + (h + 1) * hd]    # (B,S,hd)
        kh = qkv[:, :, 1 * H + h * hd:1 * H + (h + 1) * hd]
        vh = qkv[:, :, 2 * H + h * hd:2 * H + (h + 1) * hd]
        logits = jnp.einsum("bqd,bkd->bqk", qh, kh,
                            preferred_element_type=jnp.float32)
        logits = logits - jnp.max(logits, axis=-1, keepdims=True)
        e = jnp.exp(logits)
        p = e / jnp.sum(e, axis=-1, keepdims=True)        # exact divide (parity)
        w_sum = w_sum + p
        ctxs.append(jnp.einsum("bqk,bkd->bqd", p, vh,
                               preferred_element_type=jnp.float32))

    ctx = jnp.concatenate(ctxs, axis=-1)                  # (B, S, H), head order
    out = (jnp.dot(ctx.reshape(B * S, H), wout,
                   preferred_element_type=jnp.float32) + bout).reshape(B, S, H)
    w_mean = w_sum * (1.0 / NUM_HEADS)                    # (B, S, S) head-avg

    # single fused output tile: [ attn_out | attn_weights ]
    out_ref[...] = jnp.concatenate([out, w_mean], axis=-1)     # (B, S, H+S)


# -----------------------------------------------------------------------------
# Wrapper
# -----------------------------------------------------------------------------
def neural_cognitive_encoder(x, params):
    """x: (batch, seq, input_dim) float32 -> (attn_out, attn_weights)."""
    B, S, Din = x.shape
    W = params["W"]
    Bm = params["B"]
    H = W.shape[1] // 4

    vmem = pl.BlockSpec(memory_space=pltpu.MemorySpace.VMEM)
    fused = pl.pallas_call(
        encoder_kernel,
        out_shape=jax.ShapeDtypeStruct((B, S, H + S), jnp.float32),
        in_specs=[vmem, vmem, vmem],
        out_specs=pl.BlockSpec(memory_space=pltpu.MemorySpace.VMEM),
    )(x, W, Bm)

    attn_out = fused[:, :, :H]                            # (B, S, H)
    # PyTorch: MHA returns head-averaged weights (B, S, S); the module then
    # does .view(seq_len, batch_size, seq_len) — a raw row-major
    # reinterpretation (NOT a transpose); jnp.reshape reproduces it exactly.
    attn_weights = fused[:, :, H:].reshape(S, B, S)
    return attn_out, attn_weights


def init_params(key, input_dim, hidden_dim):
    """PyTorch-layout params, pre-permuted / pre-scaled / packed for the kernel."""
    H = hidden_dim
    ks = jax.random.split(key, 12)

    def rnd(k, shape, scale=0.1):
        return jax.random.normal(k, shape, jnp.float32) * scale

    # PyTorch-layout parameters (gate order [i, f, g, o]).
    w_ih_l0 = rnd(ks[0], (4 * H, input_dim))
    w_hh_l0 = rnd(ks[1], (4 * H, H))
    b_ih_l0 = rnd(ks[2], (4 * H,))
    b_hh_l0 = rnd(ks[3], (4 * H,))
    w_ih_l1 = rnd(ks[4], (4 * H, H))
    w_hh_l1 = rnd(ks[5], (4 * H, H))
    b_ih_l1 = rnd(ks[6], (4 * H,))
    b_hh_l1 = rnd(ks[7], (4 * H,))
    in_proj_w = rnd(ks[8], (3 * H, H))
    in_proj_b = rnd(ks[9], (3 * H,))
    out_proj_w = rnd(ks[10], (H, H))
    out_proj_b = rnd(ks[11], (H,))

    # Gate-column permutation: PyTorch [i, f, g, o] -> kernel [i, f, o, g].
    perm = jnp.concatenate([jnp.arange(0, H), jnp.arange(H, 2 * H),
                            jnp.arange(3 * H, 4 * H), jnp.arange(2 * H, 3 * H)])

    def lstm_w(w):              # (4H, in) -> (in, 4H), gate-permuted
        return w.T[:, perm]

    def lstm_b(bi, bh):         # combined bias, gate-permuted, (1, 4H)
        return (bi + bh)[perm][None, :]

    wih0 = lstm_w(w_ih_l0)      # (Din, 4H)
    whh0 = lstm_w(w_hh_l0)      # (H, 4H)
    w1ih = lstm_w(w_ih_l1)      # (H, 4H)
    w1hh = lstm_w(w_hh_l1)      # (H, 4H)
    b0 = lstm_b(b_ih_l0, b_hh_l0)
    b1 = lstm_b(b_ih_l1, b_hh_l1)

    # Attention in/out projections (pre-transposed); fold 1/sqrt(head_dim)
    # into the q block of the in-projection (param-time transform).
    scale = 1.0 / math.sqrt(H // NUM_HEADS)
    qmask = jnp.concatenate([jnp.full((H,), scale, jnp.float32),
                             jnp.ones((2 * H,), jnp.float32)])
    win = in_proj_w.T * qmask[None, :]            # (H, 3H)
    bin_ = in_proj_b * qmask                      # (3H,)
    wout = out_proj_w.T                           # (H, H)
    bout = out_proj_b                             # (H,)

    wa = jnp.concatenate([win, wout], axis=1)             # (H, 4H)
    ba = jnp.concatenate([bin_, bout])[None, :]           # (1, 4H)

    # Packed operands: one weight slab, one bias slab.
    W = jnp.concatenate([wih0, whh0, w1ih, w1hh, wa], axis=0)   # (Din+4H, 4H)
    Bm = jnp.concatenate([b0, b1, ba], axis=0)                  # (3, 4H)
    return dict(W=W, B=Bm)


if __name__ == "__main__":
    B, S, D_IN, HIDDEN = 2, 8, 16, 32

    key = jax.random.PRNGKey(0)
    k_x, k_p = jax.random.split(key)
    x = jax.random.normal(k_x, (B, S, D_IN), jnp.float32)
    params = init_params(k_p, D_IN, HIDDEN)

    attn_out, attn_weights = jax.jit(neural_cognitive_encoder)(x, params)
    jax.block_until_ready((attn_out, attn_weights))

    assert attn_out.shape == (B, S, HIDDEN)
    assert attn_weights.shape == (S, B, S)
    print("KERNEL_OK")
</pallas_src>

<mosaic_0001>
module attributes {stable_mosaic.version = 11 : i64} {
  func.func @encoder_kernel(%arg0: memref<2x8x16xf32, #tpu.memory_space<vmem>>, %arg1: memref<144x128xf32, #tpu.memory_space<vmem>>, %arg2: memref<3x128xf32, #tpu.memory_space<vmem>>, %arg3: memref<2x8x40xf32, #tpu.memory_space<vmem>>) attributes {dimension_semantics = [], scalar_prefetch = 0 : i64, scratch_operands = 0 : i64, tpu.core_type = #tpu.core_type<tc>} {
    %c0 = arith.constant 0 : index
    %c0_0 = arith.constant 0 : index
    %0 = vector.load %arg1[%c0, %c0_0] : memref<144x128xf32, #tpu.memory_space<vmem>>, vector<16x128xf32>
    %c16 = arith.constant 16 : index
    %c0_1 = arith.constant 0 : index
    %1 = vector.load %arg1[%c16, %c0_1] : memref<144x128xf32, #tpu.memory_space<vmem>>, vector<32x128xf32>
    %c48 = arith.constant 48 : index
    %c0_2 = arith.constant 0 : index
    %2 = vector.load %arg1[%c48, %c0_2] : memref<144x128xf32, #tpu.memory_space<vmem>>, vector<32x128xf32>
    %c80 = arith.constant 80 : index
    %c0_3 = arith.constant 0 : index
    %3 = vector.load %arg1[%c80, %c0_3] : memref<144x128xf32, #tpu.memory_space<vmem>>, vector<32x128xf32>
    %c112 = arith.constant 112 : index
    %c0_4 = arith.constant 0 : index
    %4 = vector.load %arg1[%c112, %c0_4] : memref<144x128xf32, #tpu.memory_space<vmem>>, vector<32x128xf32>
    %5 = vector.extract_strided_slice %4 {offsets = [0, 0], sizes = [32, 96], strides = [1, 1]} : vector<32x128xf32> to vector<32x96xf32>
    %6 = vector.extract_strided_slice %4 {offsets = [0, 96], sizes = [32, 32], strides = [1, 1]} : vector<32x128xf32> to vector<32x32xf32>
    %c0_5 = arith.constant 0 : index
    %c0_6 = arith.constant 0 : index
    %7 = vector.load %arg2[%c0_5, %c0_6] : memref<3x128xf32, #tpu.memory_space<vmem>>, vector<3x128xf32>
    %8 = vector.extract_strided_slice %7 {offsets = [0, 0], sizes = [1, 128], strides = [1, 1]} : vector<3x128xf32> to vector<1x128xf32>
    %9 = vector.extract_strided_slice %7 {offsets = [1, 0], sizes = [1, 128], strides = [1, 1]} : vector<3x128xf32> to vector<1x128xf32>
    %10 = vector.extract_strided_slice %7 {offsets = [2, 0], sizes = [1, 96], strides = [1, 1]} : vector<3x128xf32> to vector<1x96xf32>
    %11 = vector.extract_strided_slice %7 {offsets = [2, 96], sizes = [1, 32], strides = [1, 1]} : vector<3x128xf32> to vector<1x32xf32>
    %c0_7 = arith.constant 0 : index
    %c0_8 = arith.constant 0 : index
    %c0_9 = arith.constant 0 : index
    %12 = vector.load %arg0[%c0_7, %c0_8, %c0_9] : memref<2x8x16xf32, #tpu.memory_space<vmem>>, vector<2x8x16xf32>
    %13 = tpu.transpose %12, [1, 0, 2] : vector<2x8x16xf32> -> vector<8x2x16xf32>
    %14 = vector.shape_cast %13 : vector<8x2x16xf32> to vector<16x16xf32>
    %cst = arith.constant dense<0.000000e+00> : vector<16x128xf32>
    %15 = tpu.matmul %14, %0, %cst {dimension_numbers = #tpu.dot_dimension_numbers<[1], [0], [0], [1], [0, 0, 1, 1], [], []>} : vector<16x16xf32>, vector<16x128xf32>, vector<16x128xf32> -> vector<16x128xf32>
    %16 = vector.broadcast %8 : vector<1x128xf32> to vector<16x128xf32>
    %17 = arith.addf %15, %16 : vector<16x128xf32>
    %cst_10 = arith.constant 0.000000e+00 : f32
    %18 = vector.broadcast %cst_10 : f32 to vector<2x32xf32>
    %cst_11 = arith.constant 0.000000e+00 : f32
    %19 = vector.broadcast %cst_11 : f32 to vector<2x32xf32>
    %cst_12 = arith.constant 0.000000e+00 : f32
    %20 = vector.broadcast %cst_12 : f32 to vector<2x32xf32>
    %cst_13 = arith.constant 0.000000e+00 : f32
    %21 = vector.broadcast %cst_13 : f32 to vector<2x32xf32>
    %22 = vector.extract_strided_slice %17 {offsets = [0, 0], sizes = [2, 128], strides = [1, 1]} : vector<16x128xf32> to vector<2x128xf32>
    %cst_14 = arith.constant dense<0.000000e+00> : vector<2x128xf32>
    %23 = tpu.matmul %18, %1, %cst_14 {dimension_numbers = #tpu.dot_dimension_numbers<[1], [0], [0], [1], [0, 0, 1, 1], [], []>} : vector<2x32xf32>, vector<32x128xf32>, vector<2x128xf32> -> vector<2x128xf32>
    %24 = arith.addf %22, %23 : vector<2x128xf32>
    %25 = vector.extract_strided_slice %24 {offsets = [0, 0], sizes = [2, 96], strides = [1, 1]} : vector<2x128xf32> to vector<2x96xf32>
    %26 = arith.negf %25 : vector<2x96xf32>
    %27 = math.exp %26 : vector<2x96xf32>
    %cst_15 = arith.constant 1.000000e+00 : f32
    %28 = vector.broadcast %cst_15 : f32 to vector<2x96xf32>
    %29 = arith.addf %28, %27 : vector<2x96xf32>
    %30 = arith.divf %28, %29 : vector<2x96xf32>
    %31 = vector.extract_strided_slice %30 {offsets = [0, 0], sizes = [2, 32], strides = [1, 1]} : vector<2x96xf32> to vector<2x32xf32>
    %32 = vector.extract_strided_slice %30 {offsets = [0, 32], sizes = [2, 32], strides = [1, 1]} : vector<2x96xf32> to vector<2x32xf32>
    %33 = vector.extract_strided_slice %30 {offsets = [0, 64], sizes = [2, 32], strides = [1, 1]} : vector<2x96xf32> to vector<2x32xf32>
    %34 = vector.extract_strided_slice %24 {offsets = [0, 96], sizes = [2, 32], strides = [1, 1]} : vector<2x128xf32> to vector<2x32xf32>
    %35 = math.tanh %34 : vector<2x32xf32>
    %36 = arith.mulf %32, %19 : vector<2x32xf32>
    %37 = arith.mulf %31, %35 : vector<2x32xf32>
    %38 = arith.addf %36, %37 : vector<2x32xf32>
    %39 = math.tanh %38 : vector<2x32xf32>
    %40 = arith.mulf %33, %39 : vector<2x32xf32>
    %cst_16 = arith.constant dense<0.000000e+00> : vector<2x128xf32>
    %41 = tpu.matmul %40, %2, %cst_16 {dimension_numbers = #tpu.dot_dimension_numbers<[1], [0], [0], [1], [0, 0, 1, 1], [], []>} : vector<2x32xf32>, vector<32x128xf32>, vector<2x128xf32> -> vector<2x128xf32>
    %cst_17 = arith.constant dense<0.000000e+00> : vector<2x128xf32>
    %42 = tpu.matmul %20, %3, %cst_17 {dimension_numbers = #tpu.dot_dimension_numbers<[1], [0], [0], [1], [0, 0, 1, 1], [], []>} : vector<2x32xf32>, vector<32x128xf32>, vector<2x128xf32> -> vector<2x128xf32>
    %43 = arith.addf %41, %42 : vector<2x128xf32>
    %44 = vector.broadcast %9 : vector<1x128xf32> to vector<2x128xf32>
    %45 = arith.addf %43, %44 : vector<2x128xf32>
    %46 = vector.extract_strided_slice %45 {offsets = [0, 0], sizes = [2, 96], strides = [1, 1]} : vector<2x128xf32> to vector<2x96xf32>
    %47 = arith.negf %46 : vector<2x96xf32>
    %48 = math.exp %47 : vector<2x96xf32>
    %cst_18 = arith.constant 1.000000e+00 : f32
    %49 = vector.broadcast %cst_18 : f32 to vector<2x96xf32>
    %50 = arith.addf %49, %48 : vector<2x96xf32>
    %51 = arith.divf %49, %50 : vector<2x96xf32>
    %52 = vector.extract_strided_slice %51 {offsets = [0, 0], sizes = [2, 32], strides = [1, 1]} : vector<2x96xf32> to vector<2x32xf32>
    %53 = vector.extract_strided_slice %51 {offsets = [0, 32], sizes = [2, 32], strides = [1, 1]} : vector<2x96xf32> to vector<2x32xf32>
    %54 = vector.extract_strided_slice %51 {offsets = [0, 64], sizes = [2, 32], strides = [1, 1]} : vector<2x96xf32> to vector<2x32xf32>
    %55 = vector.extract_strided_slice %45 {offsets = [0, 96], sizes = [2, 32], strides = [1, 1]} : vector<2x128xf32> to vector<2x32xf32>
    %56 = math.tanh %55 : vector<2x32xf32>
    %57 = arith.mulf %53, %21 : vector<2x32xf32>
    %58 = arith.mulf %52, %56 : vector<2x32xf32>
    %59 = arith.addf %57, %58 : vector<2x32xf32>
    %60 = math.tanh %59 : vector<2x32xf32>
    %61 = arith.mulf %54, %60 : vector<2x32xf32>
    %62 = vector.extract_strided_slice %17 {offsets = [2, 0], sizes = [2, 128], strides = [1, 1]} : vector<16x128xf32> to vector<2x128xf32>
    %cst_19 = arith.constant dense<0.000000e+00> : vector<2x128xf32>
    %63 = tpu.matmul %40, %1, %cst_19 {dimension_numbers = #tpu.dot_dimension_numbers<[1], [0], [0], [1], [0, 0, 1, 1], [], []>} : vector<2x32xf32>, vector<32x128xf32>, vector<2x128xf32> -> vector<2x128xf32>
    %64 = arith.addf %62, %63 : vector<2x128xf32>
    %65 = vector.extract_strided_slice %64 {offsets = [0, 0], sizes = [2, 96], strides = [1, 1]} : vector<2x128xf32> to vector<2x96xf32>
    %66 = arith.negf %65 : vector<2x96xf32>
    %67 = math.exp %66 : vector<2x96xf32>
    %cst_20 = arith.constant 1.000000e+00 : f32
    %68 = vector.broadcast %cst_20 : f32 to vector<2x96xf32>
    %69 = arith.addf %68, %67 : vector<2x96xf32>
    %70 = arith.divf %68, %69 : vector<2x96xf32>
    %71 = vector.extract_strided_slice %70 {offsets = [0, 0], sizes = [2, 32], strides = [1, 1]} : vector<2x96xf32> to vector<2x32xf32>
    %72 = vector.extract_strided_slice %70 {offsets = [0, 32], sizes = [2, 32], strides = [1, 1]} : vector<2x96xf32> to vector<2x32xf32>
    %73 = vector.extract_strided_slice %70 {offsets = [0, 64], sizes = [2, 32], strides = [1, 1]} : vector<2x96xf32> to vector<2x32xf32>
    %74 = vector.extract_strided_slice %64 {offsets = [0, 96], sizes = [2, 32], strides = [1, 1]} : vector<2x128xf32> to vector<2x32xf32>
    %75 = math.tanh %74 : vector<2x32xf32>
    %76 = arith.mulf %72, %38 : vector<2x32xf32>
    %77 = arith.mulf %71, %75 : vector<2x32xf32>
    %78 = arith.addf %76, %77 : vector<2x32xf32>
    %79 = math.tanh %78 : vector<2x32xf32>
    %80 = arith.mulf %73, %79 : vector<2x32xf32>
    %cst_21 = arith.constant dense<0.000000e+00> : vector<2x128xf32>
    %81 = tpu.matmul %80, %2, %cst_21 {dimension_numbers = #tpu.dot_dimension_numbers<[1], [0], [0], [1], [0, 0, 1, 1], [], []>} : vector<2x32xf32>, vector<32x128xf32>, vector<2x128xf32> -> vector<2x128xf32>
    %cst_22 = arith.constant dense<0.000000e+00> : vector<2x128xf32>
    %82 = tpu.matmul %61, %3, %cst_22 {dimension_numbers = #tpu.dot_dimension_numbers<[1], [0], [0], [1], [0, 0, 1, 1], [], []>} : vector<2x32xf32>, vector<32x128xf32>, vector<2x128xf32> -> vector<2x128xf32>
    %83 = arith.addf %81, %82 : vector<2x128xf32>
    %84 = vector.broadcast %9 : vector<1x128xf32> to vector<2x128xf32>
    %85 = arith.addf %83, %84 : vector<2x128xf32>
    %86 = vector.extract_strided_slice %85 {offsets = [0, 0], sizes = [2, 96], strides = [1, 1]} : vector<2x128xf32> to vector<2x96xf32>
    %87 = arith.negf %86 : vector<2x96xf32>
    %88 = math.exp %87 : vector<2x96xf32>
    %cst_23 = arith.constant 1.000000e+00 : f32
    %89 = vector.broadcast %cst_23 : f32 to vector<2x96xf32>
    %90 = arith.addf %89, %88 : vector<2x96xf32>
    %91 = arith.divf %89, %90 : vector<2x96xf32>
    %92 = vector.extract_strided_slice %91 {offsets = [0, 0], sizes = [2, 32], strides = [1, 1]} : vector<2x96xf32> to vector<2x32xf32>
    %93 = vector.extract_strided_slice %91 {offsets = [0, 32], sizes = [2, 32], strides = [1, 1]} : vector<2x96xf32> to vector<2x32xf32>
    %94 = vector.extract_strided_slice %91 {offsets = [0, 64], sizes = [2, 32], strides = [1, 1]} : vector<2x96xf32> to vector<2x32xf32>
    %95 = vector.extract_strided_slice %85 {offsets = [0, 96], sizes = [2, 32], strides = [1, 1]} : vector<2x128xf32> to vector<2x32xf32>
    %96 = math.tanh %95 : vector<2x32xf32>
    %97 = arith.mulf %93, %59 : vector<2x32xf32>
    %98 = arith.mulf %92, %96 : vector<2x32xf32>
    %99 = arith.addf %97, %98 : vector<2x32xf32>
    %100 = math.tanh %99 : vector<2x32xf32>
    %101 = arith.mulf %94, %100 : vector<2x32xf32>
    %102 = vector.extract_strided_slice %17 {offsets = [4, 0], sizes = [2, 128], strides = [1, 1]} : vector<16x128xf32> to vector<2x128xf32>
    %cst_24 = arith.constant dense<0.000000e+00> : vector<2x128xf32>
    %103 = tpu.matmul %80, %1, %cst_24 {dimension_numbers = #tpu.dot_dimension_numbers<[1], [0], [0], [1], [0, 0, 1, 1], [], []>} : vector<2x32xf32>, vector<32x128xf32>, vector<2x128xf32> -> vector<2x128xf32>
    %104 = arith.addf %102, %103 : vector<2x128xf32>
    %105 = vector.extract_strided_slice %104 {offsets = [0, 0], sizes = [2, 96], strides = [1, 1]} : vector<2x128xf32> to vector<2x96xf32>
    %106 = arith.negf %105 : vector<2x96xf32>
    %107 = math.exp %106 : vector<2x96xf32>
    %cst_25 = arith.constant 1.000000e+00 : f32
    %108 = vector.broadcast %cst_25 : f32 to vector<2x96xf32>
    %109 = arith.addf %108, %107 : vector<2x96xf32>
    %110 = arith.divf %108, %109 : vector<2x96xf32>
    %111 = vector.extract_strided_slice %110 {offsets = [0, 0], sizes = [2, 32], strides = [1, 1]} : vector<2x96xf32> to vector<2x32xf32>
    %112 = vector.extract_strided_slice %110 {offsets = [0, 32], sizes = [2, 32], strides = [1, 1]} : vector<2x96xf32> to vector<2x32xf32>
    %113 = vector.extract_strided_slice %110 {offsets = [0, 64], sizes = [2, 32], strides = [1, 1]} : vector<2x96xf32> to vector<2x32xf32>
    %114 = vector.extract_strided_slice %104 {offsets = [0, 96], sizes = [2, 32], strides = [1, 1]} : vector<2x128xf32> to vector<2x32xf32>
    %115 = math.tanh %114 : vector<2x32xf32>
    %116 = arith.mulf %112, %78 : vector<2x32xf32>
    %117 = arith.mulf %111, %115 : vector<2x32xf32>
    %118 = arith.addf %116, %117 : vector<2x32xf32>
    %119 = math.tanh %118 : vector<2x32xf32>
    %120 = arith.mulf %113, %119 : vector<2x32xf32>
    %cst_26 = arith.constant dense<0.000000e+00> : vector<2x128xf32>
    %121 = tpu.matmul %120, %2, %cst_26 {dimension_numbers = #tpu.dot_dimension_numbers<[1], [0], [0], [1], [0, 0, 1, 1], [], []>} : vector<2x32xf32>, vector<32x128xf32>, vector<2x128xf32> -> vector<2x128xf32>
    %cst_27 = arith.constant dense<0.000000e+00> : vector<2x128xf32>
    %122 = tpu.matmul %101, %3, %cst_27 {dimension_numbers = #tpu.dot_dimension_numbers<[1], [0], [0], [1], [0, 0, 1, 1], [], []>} : vector<2x32xf32>, vector<32x128xf32>, vector<2x128xf32> -> vector<2x128xf32>
    %123 = arith.addf %121, %122 : vector<2x128xf32>
    %124 = vector.broadcast %9 : vector<1x128xf32> to vector<2x128xf32>
    %125 = arith.addf %123, %124 : vector<2x128xf32>
    %126 = vector.extract_strided_slice %125 {offsets = [0, 0], sizes = [2, 96], strides = [1, 1]} : vector<2x128xf32> to vector<2x96xf32>
    %127 = arith.negf %126 : vector<2x96xf32>
    %128 = math.exp %127 : vector<2x96xf32>
    %cst_28 = arith.constant 1.000000e+00 : f32
    %129 = vector.broadcast %cst_28 : f32 to vector<2x96xf32>
    %130 = arith.addf %129, %128 : vector<2x96xf32>
    %131 = arith.divf %129, %130 : vector<2x96xf32>
    %132 = vector.extract_strided_slice %131 {offsets = [0, 0], sizes = [2, 32], strides = [1, 1]} : vector<2x96xf32> to vector<2x32xf32>
    %133 = vector.extract_strided_slice %131 {offsets = [0, 32], sizes = [2, 32], strides = [1, 1]} : vector<2x96xf32> to vector<2x32xf32>
    %134 = vector.extract_strided_slice %131 {offsets = [0, 64], sizes = [2, 32], strides = [1, 1]} : vector<2x96xf32> to vector<2x32xf32>
    %135 = vector.extract_strided_slice %125 {offsets = [0, 96], sizes = [2, 32], strides = [1, 1]} : vector<2x128xf32> to vector<2x32xf32>
    %136 = math.tanh %135 : vector<2x32xf32>
    %137 = arith.mulf %133, %99 : vector<2x32xf32>
    %138 = arith.mulf %132, %136 : vector<2x32xf32>
    %139 = arith.addf %137, %138 : vector<2x32xf32>
    %140 = math.tanh %139 : vector<2x32xf32>
    %141 = arith.mulf %134, %140 : vector<2x32xf32>
    %142 = vector.extract_strided_slice %17 {offsets = [6, 0], sizes = [2, 128], strides = [1, 1]} : vector<16x128xf32> to vector<2x128xf32>
    %cst_29 = arith.constant dense<0.000000e+00> : vector<2x128xf32>
    %143 = tpu.matmul %120, %1, %cst_29 {dimension_numbers = #tpu.dot_dimension_numbers<[1], [0], [0], [1], [0, 0, 1, 1], [], []>} : vector<2x32xf32>, vector<32x128xf32>, vector<2x128xf32> -> vector<2x128xf32>
    %144 = arith.addf %142, %143 : vector<2x128xf32>
    %145 = vector.extract_strided_slice %144 {offsets = [0, 0], sizes = [2, 96], strides = [1, 1]} : vector<2x128xf32> to vector<2x96xf32>
    %146 = arith.negf %145 : vector<2x96xf32>
    %147 = math.exp %146 : vector<2x96xf32>
    %cst_30 = arith.constant 1.000000e+00 : f32
    %148 = vector.broadcast %cst_30 : f32 to vector<2x96xf32>
    %149 = arith.addf %148, %147 : vector<2x96xf32>
    %150 = arith.divf %148, %149 : vector<2x96xf32>
    %151 = vector.extract_strided_slice %150 {offsets = [0, 0], sizes = [2, 32], strides = [1, 1]} : vector<2x96xf32> to vector<2x32xf32>
    %152 = vector.extract_strided_slice %150 {offsets = [0, 32], sizes = [2, 32], strides = [1, 1]} : vector<2x96xf32> to vector<2x32xf32>
    %153 = vector.extract_strided_slice %150 {offsets = [0, 64], sizes = [2, 32], strides = [1, 1]} : vector<2x96xf32> to vector<2x32xf32>
    %154 = vector.extract_strided_slice %144 {offsets = [0, 96], sizes = [2, 32], strides = [1, 1]} : vector<2x128xf32> to vector<2x32xf32>
    %155 = math.tanh %154 : vector<2x32xf32>
    %156 = arith.mulf %152, %118 : vector<2x32xf32>
    %157 = arith.mulf %151, %155 : vector<2x32xf32>
    %158 = arith.addf %156, %157 : vector<2x32xf32>
    %159 = math.tanh %158 : vector<2x32xf32>
    %160 = arith.mulf %153, %159 : vector<2x32xf32>
    %cst_31 = arith.constant dense<0.000000e+00> : vector<2x128xf32>
    %161 = tpu.matmul %160, %2, %cst_31 {dimension_numbers = #tpu.dot_dimension_numbers<[1], [0], [0], [1], [0, 0, 1, 1], [], []>} : vector<2x32xf32>, vector<32x128xf32>, vector<2x128xf32> -> vector<2x128xf32>
    %cst_32 = arith.constant dense<0.000000e+00> : vector<2x128xf32>
    %162 = tpu.matmul %141, %3, %cst_32 {dimension_numbers = #tpu.dot_dimension_numbers<[1], [0], [0], [1], [0, 0, 1, 1], [], []>} : vector<2x32xf32>, vector<32x128xf32>, vector<2x128xf32> -> vector<2x128xf32>
    %163 = arith.addf %161, %162 : vector<2x128xf32>
    %164 = vector.broadcast %9 : vector<1x128xf32> to vector<2x128xf32>
    %165 = arith.addf %163, %164 : vector<2x128xf32>
    %166 = vector.extract_strided_slice %165 {offsets = [0, 0], sizes = [2, 96], strides = [1, 1]} : vector<2x128xf32> to vector<2x96xf32>
    %167 = arith.negf %166 : vector<2x96xf32>
    %168 = math.exp %167 : vector<2x96xf32>
    %cst_33 = arith.constant 1.000000e+00 : f32
    %169 = vector.broadcast %cst_33 : f32 to vector<2x96xf32>
    %170 = arith.addf %169, %168 : vector<2x96xf32>
    %171 = arith.divf %169, %170 : vector<2x96xf32>
    %172 = vector.extract_strided_slice %171 {offsets = [0, 0], sizes = [2, 32], strides = [1, 1]} : vector<2x96xf32> to vector<2x32xf32>
    %173 = vector.extract_strided_slice %171 {offsets = [0, 32], sizes = [2, 32], strides = [1, 1]} : vector<2x96xf32> to vector<2x32xf32>
    %174 = vector.extract_strided_slice %171 {offsets = [0, 64], sizes = [2, 32], strides = [1, 1]} : vector<2x96xf32> to vector<2x32xf32>
    %175 = vector.extract_strided_slice %165 {offsets = [0, 96], sizes = [2, 32], strides = [1, 1]} : vector<2x128xf32> to vector<2x32xf32>
    %176 = math.tanh %175 : vector<2x32xf32>
    %177 = arith.mulf %173, %139 : vector<2x32xf32>
    %178 = arith.mulf %172, %176 : vector<2x32xf32>
    %179 = arith.addf %177, %178 : vector<2x32xf32>
    %180 = math.tanh %179 : vector<2x32xf32>
    %181 = arith.mulf %174, %180 : vector<2x32xf32>
    %182 = vector.extract_strided_slice %17 {offsets = [8, 0], sizes = [2, 128], strides = [1, 1]} : vector<16x128xf32> to vector<2x128xf32>
    %cst_34 = arith.constant dense<0.000000e+00> : vector<2x128xf32>
    %183 = tpu.matmul %160, %1, %cst_34 {dimension_numbers = #tpu.dot_dimension_numbers<[1], [0], [0], [1], [0, 0, 1, 1], [], []>} : vector<2x32xf32>, vector<32x128xf32>, vector<2x128xf32> -> vector<2x128xf32>
    %184 = arith.addf %182, %183 : vector<2x128xf32>
    %185 = vector.extract_strided_slice %184 {offsets = [0, 0], sizes = [2, 96], strides = [1, 1]} : vector<2x128xf32> to vector<2x96xf32>
    %186 = arith.negf %185 : vector<2x96xf32>
    %187 = math.exp %186 : vector<2x96xf32>
    %cst_35 = arith.constant 1.000000e+00 : f32
    %188 = vector.broadcast %cst_35 : f32 to vector<2x96xf32>
    %189 = arith.addf %188, %187 : vector<2x96xf32>
    %190 = arith.divf %188, %189 : vector<2x96xf32>
    %191 = vector.extract_strided_slice %190 {offsets = [0, 0], sizes = [2, 32], strides = [1, 1]} : vector<2x96xf32> to vector<2x32xf32>
    %192 = vector.extract_strided_slice %190 {offsets = [0, 32], sizes = [2, 32], strides = [1, 1]} : vector<2x96xf32> to vector<2x32xf32>
    %193 = vector.extract_strided_slice %190 {offsets = [0, 64], sizes = [2, 32], strides = [1, 1]} : vector<2x96xf32> to vector<2x32xf32>
    %194 = vector.extract_strided_slice %184 {offsets = [0, 96], sizes = [2, 32], strides = [1, 1]} : vector<2x128xf32> to vector<2x32xf32>
    %195 = math.tanh %194 : vector<2x32xf32>
    %196 = arith.mulf %192, %158 : vector<2x32xf32>
    %197 = arith.mulf %191, %195 : vector<2x32xf32>
    %198 = arith.addf %196, %197 : vector<2x32xf32>
    %199 = math.tanh %198 : vector<2x32xf32>
    %200 = arith.mulf %193, %199 : vector<2x32xf32>
    %cst_36 = arith.constant dense<0.000000e+00> : vector<2x128xf32>
    %201 = tpu.matmul %200, %2, %cst_36 {dimension_numbers = #tpu.dot_dimension_numbers<[1], [0], [0], [1], [0, 0, 1, 1], [], []>} : vector<2x32xf32>, vector<32x128xf32>, vector<2x128xf32> -> vector<2x128xf32>
    %cst_37 = arith.constant dense<0.000000e+00> : vector<2x128xf32>
    %202 = tpu.matmul %181, %3, %cst_37 {dimension_numbers = #tpu.dot_dimension_numbers<[1], [0], [0], [1], [0, 0, 1, 1], [], []>} : vector<2x32xf32>, vector<32x128xf32>, vector<2x128xf32> -> vector<2x128xf32>
    %203 = arith.addf %201, %202 : vector<2x128xf32>
    %204 = vector.broadcast %9 : vector<1x128xf32> to vector<2x128xf32>
    %205 = arith.addf %203, %204 : vector<2x128xf32>
    %206 = vector.extract_strided_slice %205 {offsets = [0, 0], sizes = [2, 96], strides = [1, 1]} : vector<2x128xf32> to vector<2x96xf32>
    %207 = arith.negf %206 : vector<2x96xf32>
    %208 = math.exp %207 : vector<2x96xf32>
    %cst_38 = arith.constant 1.000000e+00 : f32
    %209 = vector.broadcast %cst_38 : f32 to vector<2x96xf32>
    %210 = arith.addf %209, %208 : vector<2x96xf32>
    %211 = arith.divf %209, %210 : vector<2x96xf32>
    %212 = vector.extract_strided_slice %211 {offsets = [0, 0], sizes = [2, 32], strides = [1, 1]} : vector<2x96xf32> to vector<2x32xf32>
    %213 = vector.extract_strided_slice %211 {offsets = [0, 32], sizes = [2, 32], strides = [1, 1]} : vector<2x96xf32> to vector<2x32xf32>
    %214 = vector.extract_strided_slice %211 {offsets = [0, 64], sizes = [2, 32], strides = [1, 1]} : vector<2x96xf32> to vector<2x32xf32>
    %215 = vector.extract_strided_slice %205 {offsets = [0, 96], sizes = [2, 32], strides = [1, 1]} : vector<2x128xf32> to vector<2x32xf32>
    %216 = math.tanh %215 : vector<2x32xf32>
    %217 = arith.mulf %213, %179 : vector<2x32xf32>
    %218 = arith.mulf %212, %216 : vector<2x32xf32>
    %219 = arith.addf %217, %218 : vector<2x32xf32>
    %220 = math.tanh %219 : vector<2x32xf32>
    %221 = arith.mulf %214, %220 : vector<2x32xf32>
    %222 = vector.extract_strided_slice %17 {offsets = [10, 0], sizes = [2, 128], strides = [1, 1]} : vector<16x128xf32> to vector<2x128xf32>
    %cst_39 = arith.constant dense<0.000000e+00> : vector<2x128xf32>
    %223 = tpu.matmul %200, %1, %cst_39 {dimension_numbers = #tpu.dot_dimension_numbers<[1], [0], [0], [1], [0, 0, 1, 1], [], []>} : vector<2x32xf32>, vector<32x128xf32>, vector<2x128xf32> -> vector<2x128xf32>
    %224 = arith.addf %222, %223 : vector<2x128xf32>
    %225 = vector.extract_strided_slice %224 {offsets = [0, 0], sizes = [2, 96], strides = [1, 1]} : vector<2x128xf32> to vector<2x96xf32>
    %226 = arith.negf %225 : vector<2x96xf32>
    %227 = math.exp %226 : vector<2x96xf32>
    %cst_40 = arith.constant 1.000000e+00 : f32
    %228 = vector.broadcast %cst_40 : f32 to vector<2x96xf32>
    %229 = arith.addf %228, %227 : vector<2x96xf32>
    %230 = arith.divf %228, %229 : vector<2x96xf32>
    %231 = vector.extract_strided_slice %230 {offsets = [0, 0], sizes = [2, 32], strides = [1, 1]} : vector<2x96xf32> to vector<2x32xf32>
    %232 = vector.extract_strided_slice %230 {offsets = [0, 32], sizes = [2, 32], strides = [1, 1]} : vector<2x96xf32> to vector<2x32xf32>
    %233 = vector.extract_strided_slice %230 {offsets = [0, 64], sizes = [2, 32], strides = [1, 1]} : vector<2x96xf32> to vector<2x32xf32>
    %234 = vector.extract_strided_slice %224 {offsets = [0, 96], sizes = [2, 32], strides = [1, 1]} : vector<2x128xf32> to vector<2x32xf32>
    %235 = math.tanh %234 : vector<2x32xf32>
    %236 = arith.mulf %232, %198 : vector<2x32xf32>
    %237 = arith.mulf %231, %235 : vector<2x32xf32>
    %238 = arith.addf %236, %237 : vector<2x32xf32>
    %239 = math.tanh %238 : vector<2x32xf32>
    %240 = arith.mulf %233, %239 : vector<2x32xf32>
    %cst_41 = arith.constant dense<0.000000e+00> : vector<2x128xf32>
    %241 = tpu.matmul %240, %2, %cst_41 {dimension_numbers = #tpu.dot_dimension_numbers<[1], [0], [0], [1], [0, 0, 1, 1], [], []>} : vector<2x32xf32>, vector<32x128xf32>, vector<2x128xf32> -> vector<2x128xf32>
    %cst_42 = arith.constant dense<0.000000e+00> : vector<2x128xf32>
    %242 = tpu.matmul %221, %3, %cst_42 {dimension_numbers = #tpu.dot_dimension_numbers<[1], [0], [0], [1], [0, 0, 1, 1], [], []>} : vector<2x32xf32>, vector<32x128xf32>, vector<2x128xf32> -> vector<2x128xf32>
    %243 = arith.addf %241, %242 : vector<2x128xf32>
    %244 = vector.broadcast %9 : vector<1x128xf32> to vector<2x128xf32>
    %245 = arith.addf %243, %244 : vector<2x128xf32>
    %246 = vector.extract_strided_slice %245 {offsets = [0, 0], sizes = [2, 96], strides = [1, 1]} : vector<2x128xf32> to vector<2x96xf32>
    %247 = arith.negf %246 : vector<2x96xf32>
    %248 = math.exp %247 : vector<2x96xf32>
    %cst_43 = arith.constant 1.000000e+00 : f32
    %249 = vector.broadcast %cst_43 : f32 to vector<2x96xf32>
    %250 = arith.addf %249, %248 : vector<2x96xf32>
    %251 = arith.divf %249, %250 : vector<2x96xf32>
    %252 = vector.extract_strided_slice %251 {offsets = [0, 0], sizes = [2, 32], strides = [1, 1]} : vector<2x96xf32> to vector<2x32xf32>
    %253 = vector.extract_strided_slice %251 {offsets = [0, 32], sizes = [2, 32], strides = [1, 1]} : vector<2x96xf32> to vector<2x32xf32>
    %254 = vector.extract_strided_slice %251 {offsets = [0, 64], sizes = [2, 32], strides = [1, 1]} : vector<2x96xf32> to vector<2x32xf32>
    %255 = vector.extract_strided_slice %245 {offsets = [0, 96], sizes = [2, 32], strides = [1, 1]} : vector<2x128xf32> to vector<2x32xf32>
    %256 = math.tanh %255 : vector<2x32xf32>
    %257 = arith.mulf %253, %219 : vector<2x32xf32>
    %258 = arith.mulf %252, %256 : vector<2x32xf32>
    %259 = arith.addf %257, %258 : vector<2x32xf32>
    %260 = math.tanh %259 : vector<2x32xf32>
    %261 = arith.mulf %254, %260 : vector<2x32xf32>
    %262 = vector.extract_strided_slice %17 {offsets = [12, 0], sizes = [2, 128], strides = [1, 1]} : vector<16x128xf32> to vector<2x128xf32>
    %cst_44 = arith.constant dense<0.000000e+00> : vector<2x128xf32>
    %263 = tpu.matmul %240, %1, %cst_44 {dimension_numbers = #tpu.dot_dimension_numbers<[1], [0], [0], [1], [0, 0, 1, 1], [], []>} : vector<2x32xf32>, vector<32x128xf32>, vector<2x128xf32> -> vector<2x128xf32>
    %264 = arith.addf %262, %263 : vector<2x128xf32>
    %265 = vector.extract_strided_slice %264 {offsets = [0, 0], sizes = [2, 96], strides = [1, 1]} : vector<2x128xf32> to vector<2x96xf32>
    %266 = arith.negf %265 : vector<2x96xf32>
    %267 = math.exp %266 : vector<2x96xf32>
    %cst_45 = arith.constant 1.000000e+00 : f32
    %268 = vector.broadcast %cst_45 : f32 to vector<2x96xf32>
    %269 = arith.addf %268, %267 : vector<2x96xf32>
    %270 = arith.divf %268, %269 : vector<2x96xf32>
    %271 = vector.extract_strided_slice %270 {offsets = [0, 0], sizes = [2, 32], strides = [1, 1]} : vector<2x96xf32> to vector<2x32xf32>
    %272 = vector.extract_strided_slice %270 {offsets = [0, 32], sizes = [2, 32], strides = [1, 1]} : vector<2x96xf32> to vector<2x32xf32>
    %273 = vector.extract_strided_slice %270 {offsets = [0, 64], sizes = [2, 32], strides = [1, 1]} : vector<2x96xf32> to vector<2x32xf32>
    %274 = vector.extract_strided_slice %264 {offsets = [0, 96], sizes = [2, 32], strides = [1, 1]} : vector<2x128xf32> to vector<2x32xf32>
    %275 = math.tanh %274 : vector<2x32xf32>
    %276 = arith.mulf %272, %238 : vector<2x32xf32>
    %277 = arith.mulf %271, %275 : vector<2x32xf32>
    %278 = arith.addf %276, %277 : vector<2x32xf32>
    %279 = math.tanh %278 : vector<2x32xf32>
    %280 = arith.mulf %273, %279 : vector<2x32xf32>
    %cst_46 = arith.constant dense<0.000000e+00> : vector<2x128xf32>
    %281 = tpu.matmul %280, %2, %cst_46 {dimension_numbers = #tpu.dot_dimension_numbers<[1], [0], [0], [1], [0, 0, 1, 1], [], []>} : vector<2x32xf32>, vector<32x128xf32>, vector<2x128xf32> -> vector<2x128xf32>
    %cst_47 = arith.constant dense<0.000000e+00> : vector<2x128xf32>
    %282 = tpu.matmul %261, %3, %cst_47 {dimension_numbers = #tpu.dot_dimension_numbers<[1], [0], [0], [1], [0, 0, 1, 1], [], []>} : vector<2x32xf32>, vector<32x128xf32>, vector<2x128xf32> -> vector<2x128xf32>
    %283 = arith.addf %281, %282 : vector<2x128xf32>
    %284 = vector.broadcast %9 : vector<1x128xf32> to vector<2x128xf32>
    %285 = arith.addf %283, %284 : vector<2x128xf32>
    %286 = vector.extract_strided_slice %285 {offsets = [0, 0], sizes = [2, 96], strides = [1, 1]} : vector<2x128xf32> to vector<2x96xf32>
    %287 = arith.negf %286 : vector<2x96xf32>
    %288 = math.exp %287 : vector<2x96xf32>
    %cst_48 = arith.constant 1.000000e+00 : f32
    %289 = vector.broadcast %cst_48 : f32 to vector<2x96xf32>
    %290 = arith.addf %289, %288 : vector<2x96xf32>
    %291 = arith.divf %289, %290 : vector<2x96xf32>
    %292 = vector.extract_strided_slice %291 {offsets = [0, 0], sizes = [2, 32], strides = [1, 1]} : vector<2x96xf32> to vector<2x32xf32>
    %293 = vector.extract_strided_slice %291 {offsets = [0, 32], sizes = [2, 32], strides = [1, 1]} : vector<2x96xf32> to vector<2x32xf32>
    %294 = vector.extract_strided_slice %291 {offsets = [0, 64], sizes = [2, 32], strides = [1, 1]} : vector<2x96xf32> to vector<2x32xf32>
    %295 = vector.extract_strided_slice %285 {offsets = [0, 96], sizes = [2, 32], strides = [1, 1]} : vector<2x128xf32> to vector<2x32xf32>
    %296 = math.tanh %295 : vector<2x32xf32>
    %297 = arith.mulf %293, %259 : vector<2x32xf32>
    %298 = arith.mulf %292, %296 : vector<2x32xf32>
    %299 = arith.addf %297, %298 : vector<2x32xf32>
    %300 = math.tanh %299 : vector<2x32xf32>
    %301 = arith.mulf %294, %300 : vector<2x32xf32>
    %302 = vector.extract_strided_slice %17 {offsets = [14, 0], sizes = [2, 128], strides = [1, 1]} : vector<16x128xf32> to vector<2x128xf32>
    %cst_49 = arith.constant dense<0.000000e+00> : vector<2x128xf32>
    %303 = tpu.matmul %280, %1, %cst_49 {dimension_numbers = #tpu.dot_dimension_numbers<[1], [0], [0], [1], [0, 0, 1, 1], [], []>} : vector<2x32xf32>, vector<32x128xf32>, vector<2x128xf32> -> vector<2x128xf32>
    %304 = arith.addf %302, %303 : vector<2x128xf32>
    %305 = vector.extract_strided_slice %304 {offsets = [0, 0], sizes = [2, 96], strides = [1, 1]} : vector<2x128xf32> to vector<2x96xf32>
    %306 = arith.negf %305 : vector<2x96xf32>
    %307 = math.exp %306 : vector<2x96xf32>
    %cst_50 = arith.constant 1.000000e+00 : f32
    %308 = vector.broadcast %cst_50 : f32 to vector<2x96xf32>
    %309 = arith.addf %308, %307 : vector<2x96xf32>
    %310 = arith.divf %308, %309 : vector<2x96xf32>
    %311 = vector.extract_strided_slice %310 {offsets = [0, 0], sizes = [2, 32], strides = [1, 1]} : vector<2x96xf32> to vector<2x32xf32>
    %312 = vector.extract_strided_slice %310 {offsets = [0, 32], sizes = [2, 32], strides = [1, 1]} : vector<2x96xf32> to vector<2x32xf32>
    %313 = vector.extract_strided_slice %310 {offsets = [0, 64], sizes = [2, 32], strides = [1, 1]} : vector<2x96xf32> to vector<2x32xf32>
    %314 = vector.extract_strided_slice %304 {offsets = [0, 96], sizes = [2, 32], strides = [1, 1]} : vector<2x128xf32> to vector<2x32xf32>
    %315 = math.tanh %314 : vector<2x32xf32>
    %316 = arith.mulf %312, %278 : vector<2x32xf32>
    %317 = arith.mulf %311, %315 : vector<2x32xf32>
    %318 = arith.addf %316, %317 : vector<2x32xf32>
    %319 = math.tanh %318 : vector<2x32xf32>
    %320 = arith.mulf %313, %319 : vector<2x32xf32>
    %cst_51 = arith.constant dense<0.000000e+00> : vector<2x128xf32>
    %321 = tpu.matmul %320, %2, %cst_51 {dimension_numbers = #tpu.dot_dimension_numbers<[1], [0], [0], [1], [0, 0, 1, 1], [], []>} : vector<2x32xf32>, vector<32x128xf32>, vector<2x128xf32> -> vector<2x128xf32>
    %cst_52 = arith.constant dense<0.000000e+00> : vector<2x128xf32>
    %322 = tpu.matmul %301, %3, %cst_52 {dimension_numbers = #tpu.dot_dimension_numbers<[1], [0], [0], [1], [0, 0, 1, 1], [], []>} : vector<2x32xf32>, vector<32x128xf32>, vector<2x128xf32> -> vector<2x128xf32>
    %323 = arith.addf %321, %322 : vector<2x128xf32>
    %324 = vector.broadcast %9 : vector<1x128xf32> to vector<2x128xf32>
    %325 = arith.addf %323, %324 : vector<2x128xf32>
    %326 = vector.extract_strided_slice %325 {offsets = [0, 0], sizes = [2, 96], strides = [1, 1]} : vector<2x128xf32> to vector<2x96xf32>
    %327 = arith.negf %326 : vector<2x96xf32>
    %328 = math.exp %327 : vector<2x96xf32>
    %cst_53 = arith.constant 1.000000e+00 : f32
    %329 = vector.broadcast %cst_53 : f32 to vector<2x96xf32>
    %330 = arith.addf %329, %328 : vector<2x96xf32>
    %331 = arith.divf %329, %330 : vector<2x96xf32>
    %332 = vector.extract_strided_slice %331 {offsets = [0, 0], sizes = [2, 32], strides = [1, 1]} : vector<2x96xf32> to vector<2x32xf32>
    %333 = vector.extract_strided_slice %331 {offsets = [0, 32], sizes = [2, 32], strides = [1, 1]} : vector<2x96xf32> to vector<2x32xf32>
    %334 = vector.extract_strided_slice %331 {offsets = [0, 64], sizes = [2, 32], strides = [1, 1]} : vector<2x96xf32> to vector<2x32xf32>
    %335 = vector.extract_strided_slice %325 {offsets = [0, 96], sizes = [2, 32], strides = [1, 1]} : vector<2x128xf32> to vector<2x32xf32>
    %336 = math.tanh %335 : vector<2x32xf32>
    %337 = arith.mulf %333, %299 : vector<2x32xf32>
    %338 = arith.mulf %332, %336 : vector<2x32xf32>
    %339 = arith.addf %337, %338 : vector<2x32xf32>
    %340 = math.tanh %339 : vector<2x32xf32>
    %341 = arith.mulf %334, %340 : vector<2x32xf32>
    %342 = tpu.concatenate %61, %101, %141, %181, %221, %261, %301, %341 in 0 : vector<2x32xf32>, vector<2x32xf32>, vector<2x32xf32>, vector<2x32xf32>, vector<2x32xf32>, vector<2x32xf32>, vector<2x32xf32>, vector<2x32xf32> -> vector<16x32xf32>
    %cst_54 = arith.constant dense<0.000000e+00> : vector<16x96xf32>
    %343 = tpu.matmul %342, %5, %cst_54 {dimension_numbers = #tpu.dot_dimension_numbers<[1], [0], [0], [1], [0, 0, 1, 1], [], []>} : vector<16x32xf32>, vector<32x96xf32>, vector<16x96xf32> -> vector<16x96xf32>
    %344 = vector.broadcast %10 : vector<1x96xf32> to vector<16x96xf32>
    %345 = arith.addf %343, %344 : vector<16x96xf32>
    %346 = vector.shape_cast %345 : vector<16x96xf32> to vector<8x2x96xf32>
    %347 = tpu.transpose %346, [1, 0, 2] : vector<8x2x96xf32> -> vector<2x8x96xf32>
    %cst_55 = arith.constant 0.000000e+00 : f32
    %348 = vector.broadcast %cst_55 : f32 to vector<2x8x8xf32>
    %349 = vector.extract_strided_slice %347 {offsets = [0, 0, 0], sizes = [2, 8, 8], strides = [1, 1, 1]} : vector<2x8x96xf32> to vector<2x8x8xf32>
    %350 = vector.extract_strided_slice %347 {offsets = [0, 0, 32], sizes = [2, 8, 8], strides = [1, 1, 1]} : vector<2x8x96xf32> to vector<2x8x8xf32>
    %351 = vector.extract_strided_slice %347 {offsets = [0, 0, 64], sizes = [2, 8, 8], strides = [1, 1, 1]} : vector<2x8x96xf32> to vector<2x8x8xf32>
    "tpu.trace_start"() <{level = 10 : i32, message = "bqd,bkd->bqk"}> : () -> ()
    %cst_56 = arith.constant dense<0.000000e+00> : vector<2x8x8xf32>
    %352 = tpu.matmul %349, %350, %cst_56 {dimension_numbers = #tpu.dot_dimension_numbers<[2], [2], [1], [1], [0, 0, 0, 1, 1, 1], [0], [0]>} : vector<2x8x8xf32>, vector<2x8x8xf32>, vector<2x8x8xf32> -> vector<2x8x8xf32>
    "tpu.trace_stop"() : () -> ()
    %cst_57 = arith.constant dense<0xFF800000> : vector<2x8xf32>
    %353 = vector.multi_reduction <maximumf>, %352, %cst_57 [2] : vector<2x8x8xf32> to vector<2x8xf32>
    %354 = vector.shape_cast %353 : vector<2x8xf32> to vector<2x8x1xf32>
    %355 = vector.broadcast %354 : vector<2x8x1xf32> to vector<2x8x8xf32>
    %356 = arith.subf %352, %355 : vector<2x8x8xf32>
    %357 = math.exp %356 : vector<2x8x8xf32>
    %cst_58 = arith.constant dense<0.000000e+00> : vector<2x8xf32>
    %358 = vector.multi_reduction <add>, %357, %cst_58 [2] : vector<2x8x8xf32> to vector<2x8xf32>
    %359 = vector.shape_cast %358 : vector<2x8xf32> to vector<2x8x1xf32>
    %360 = vector.broadcast %359 : vector<2x8x1xf32> to vector<2x8x8xf32>
    %361 = arith.divf %357, %360 : vector<2x8x8xf32>
    %362 = arith.addf %348, %361 : vector<2x8x8xf32>
    "tpu.trace_start"() <{level = 10 : i32, message = "bqk,bkd->bqd"}> : () -> ()
    %cst_59 = arith.constant dense<0.000000e+00> : vector<2x8x8xf32>
    %363 = tpu.matmul %361, %351, %cst_59 {dimension_numbers = #tpu.dot_dimension_numbers<[2], [1], [1], [2], [0, 0, 0, 1, 1, 2], [0], [0]>} : vector<2x8x8xf32>, vector<2x8x8xf32>, vector<2x8x8xf32> -> vector<2x8x8xf32>
    "tpu.trace_stop"() : () -> ()
    %364 = vector.extract_strided_slice %347 {offsets = [0, 0, 8], sizes = [2, 8, 8], strides = [1, 1, 1]} : vector<2x8x96xf32> to vector<2x8x8xf32>
    %365 = vector.extract_strided_slice %347 {offsets = [0, 0, 40], sizes = [2, 8, 8], strides = [1, 1, 1]} : vector<2x8x96xf32> to vector<2x8x8xf32>
    %366 = vector.extract_strided_slice %347 {offsets = [0, 0, 72], sizes = [2, 8, 8], strides = [1, 1, 1]} : vector<2x8x96xf32> to vector<2x8x8xf32>
    "tpu.trace_start"() <{level = 10 : i32, message = "bqd,bkd->bqk"}> : () -> ()
    %cst_60 = arith.constant dense<0.000000e+00> : vector<2x8x8xf32>
    %367 = tpu.matmul %364, %365, %cst_60 {dimension_numbers = #tpu.dot_dimension_numbers<[2], [2], [1], [1], [0, 0, 0, 1, 1, 1], [0], [0]>} : vector<2x8x8xf32>, vector<2x8x8xf32>, vector<2x8x8xf32> -> vector<2x8x8xf32>
    "tpu.trace_stop"() : () -> ()
    %cst_61 = arith.constant dense<0xFF800000> : vector<2x8xf32>
    %368 = vector.multi_reduction <maximumf>, %367, %cst_61 [2] : vector<2x8x8xf32> to vector<2x8xf32>
    %369 = vector.shape_cast %368 : vector<2x8xf32> to vector<2x8x1xf32>
    %370 = vector.broadcast %369 : vector<2x8x1xf32> to vector<2x8x8xf32>
    %371 = arith.subf %367, %370 : vector<2x8x8xf32>
    %372 = math.exp %371 : vector<2x8x8xf32>
    %cst_62 = arith.constant dense<0.000000e+00> : vector<2x8xf32>
    %373 = vector.multi_reduction <add>, %372, %cst_62 [2] : vector<2x8x8xf32> to vector<2x8xf32>
    %374 = vector.shape_cast %373 : vector<2x8xf32> to vector<2x8x1xf32>
    %375 = vector.broadcast %374 : vector<2x8x1xf32> to vector<2x8x8xf32>
    %376 = arith.divf %372, %375 : vector<2x8x8xf32>
    %377 = arith.addf %362, %376 : vector<2x8x8xf32>
    "tpu.trace_start"() <{level = 10 : i32, message = "bqk,bkd->bqd"}> : () -> ()
    %cst_63 = arith.constant dense<0.000000e+00> : vector<2x8x8xf32>
    %378 = tpu.matmul %376, %366, %cst_63 {dimension_numbers = #tpu.dot_dimension_numbers<[2], [1], [1], [2], [0, 0, 0, 1, 1, 2], [0], [0]>} : vector<2x8x8xf32>, vector<2x8x8xf32>, vector<2x8x8xf32> -> vector<2x8x8xf32>
    "tpu.trace_stop"() : () -> ()
    %379 = vector.extract_strided_slice %347 {offsets = [0, 0, 16], sizes = [2, 8, 8], strides = [1, 1, 1]} : vector<2x8x96xf32> to vector<2x8x8xf32>
    %380 = vector.extract_strided_slice %347 {offsets = [0, 0, 48], sizes = [2, 8, 8], strides = [1, 1, 1]} : vector<2x8x96xf32> to vector<2x8x8xf32>
    %381 = vector.extract_strided_slice %347 {offsets = [0, 0, 80], sizes = [2, 8, 8], strides = [1, 1, 1]} : vector<2x8x96xf32> to vector<2x8x8xf32>
    "tpu.trace_start"() <{level = 10 : i32, message = "bqd,bkd->bqk"}> : () -> ()
    %cst_64 = arith.constant dense<0.000000e+00> : vector<2x8x8xf32>
    %382 = tpu.matmul %379, %380, %cst_64 {dimension_numbers = #tpu.dot_dimension_numbers<[2], [2], [1], [1], [0, 0, 0, 1, 1, 1], [0], [0]>} : vector<2x8x8xf32>, vector<2x8x8xf32>, vector<2x8x8xf32> -> vector<2x8x8xf32>
    "tpu.trace_stop"() : () -> ()
    %cst_65 = arith.constant dense<0xFF800000> : vector<2x8xf32>
    %383 = vector.multi_reduction <maximumf>, %382, %cst_65 [2] : vector<2x8x8xf32> to vector<2x8xf32>
    %384 = vector.shape_cast %383 : vector<2x8xf32> to vector<2x8x1xf32>
    %385 = vector.broadcast %384 : vector<2x8x1xf32> to vector<2x8x8xf32>
    %386 = arith.subf %382, %385 : vector<2x8x8xf32>
    %387 = math.exp %386 : vector<2x8x8xf32>
    %cst_66 = arith.constant dense<0.000000e+00> : vector<2x8xf32>
    %388 = vector.multi_reduction <add>, %387, %cst_66 [2] : vector<2x8x8xf32> to vector<2x8xf32>
    %389 = vector.shape_cast %388 : vector<2x8xf32> to vector<2x8x1xf32>
    %390 = vector.broadcast %389 : vector<2x8x1xf32> to vector<2x8x8xf32>
    %391 = arith.divf %387, %390 : vector<2x8x8xf32>
    %392 = arith.addf %377, %391 : vector<2x8x8xf32>
    "tpu.trace_start"() <{level = 10 : i32, message = "bqk,bkd->bqd"}> : () -> ()
    %cst_67 = arith.constant dense<0.000000e+00> : vector<2x8x8xf32>
    %393 = tpu.matmul %391, %381, %cst_67 {dimension_numbers = #tpu.dot_dimension_numbers<[2], [1], [1], [2], [0, 0, 0, 1, 1, 2], [0], [0]>} : vector<2x8x8xf32>, vector<2x8x8xf32>, vector<2x8x8xf32> -> vector<2x8x8xf32>
    "tpu.trace_stop"() : () -> ()
    %394 = vector.extract_strided_slice %347 {offsets = [0, 0, 24], sizes = [2, 8, 8], strides = [1, 1, 1]} : vector<2x8x96xf32> to vector<2x8x8xf32>
    %395 = vector.extract_strided_slice %347 {offsets = [0, 0, 56], sizes = [2, 8, 8], strides = [1, 1, 1]} : vector<2x8x96xf32> to vector<2x8x8xf32>
    %396 = vector.extract_strided_slice %347 {offsets = [0, 0, 88], sizes = [2, 8, 8], strides = [1, 1, 1]} : vector<2x8x96xf32> to vector<2x8x8xf32>
    "tpu.trace_start"() <{level = 10 : i32, message = "bqd,bkd->bqk"}> : () -> ()
    %cst_68 = arith.constant dense<0.000000e+00> : vector<2x8x8xf32>
    %397 = tpu.matmul %394, %395, %cst_68 {dimension_numbers = #tpu.dot_dimension_numbers<[2], [2], [1], [1], [0, 0, 0, 1, 1, 1], [0], [0]>} : vector<2x8x8xf32>, vector<2x8x8xf32>, vector<2x8x8xf32> -> vector<2x8x8xf32>
    "tpu.trace_stop"() : () -> ()
    %cst_69 = arith.constant dense<0xFF800000> : vector<2x8xf32>
    %398 = vector.multi_reduction <maximumf>, %397, %cst_69 [2] : vector<2x8x8xf32> to vector<2x8xf32>
    %399 = vector.shape_cast %398 : vector<2x8xf32> to vector<2x8x1xf32>
    %400 = vector.broadcast %399 : vector<2x8x1xf32> to vector<2x8x8xf32>
    %401 = arith.subf %397, %400 : vector<2x8x8xf32>
    %402 = math.exp %401 : vector<2x8x8xf32>
    %cst_70 = arith.constant dense<0.000000e+00> : vector<2x8xf32>
    %403 = vector.multi_reduction <add>, %402, %cst_70 [2] : vector<2x8x8xf32> to vector<2x8xf32>
    %404 = vector.shape_cast %403 : vector<2x8xf32> to vector<2x8x1xf32>
    %405 = vector.broadcast %404 : vector<2x8x1xf32> to vector<2x8x8xf32>
    %406 = arith.divf %402, %405 : vector<2x8x8xf32>
    %407 = arith.addf %392, %406 : vector<2x8x8xf32>
    "tpu.trace_start"() <{level = 10 : i32, message = "bqk,bkd->bqd"}> : () -> ()
    %cst_71 = arith.constant dense<0.000000e+00> : vector<2x8x8xf32>
    %408 = tpu.matmul %406, %396, %cst_71 {dimension_numbers = #tpu.dot_dimension_numbers<[2], [1], [1], [2], [0, 0, 0, 1, 1, 2], [0], [0]>} : vector<2x8x8xf32>, vector<2x8x8xf32>, vector<2x8x8xf32> -> vector<2x8x8xf32>
    "tpu.trace_stop"() : () -> ()
    %409 = tpu.concatenate %363, %378, %393, %408 in 2 : vector<2x8x8xf32>, vector<2x8x8xf32>, vector<2x8x8xf32>, vector<2x8x8xf32> -> vector<2x8x32xf32>
    %410 = vector.shape_cast %409 : vector<2x8x32xf32> to vector<16x32xf32>
    %cst_72 = arith.constant dense<0.000000e+00> : vector<16x32xf32>
    %411 = tpu.matmul %410, %6, %cst_72 {dimension_numbers = #tpu.dot_dimension_numbers<[1], [0], [0], [1], [0, 0, 1, 1], [], []>} : vector<16x32xf32>, vector<32x32xf32>, vector<16x32xf32> -> vector<16x32xf32>
    %412 = vector.broadcast %11 : vector<1x32xf32> to vector<16x32xf32>
    %413 = arith.addf %411, %412 : vector<16x32xf32>
    %414 = vector.shape_cast %413 : vector<16x32xf32> to vector<2x8x32xf32>
    %cst_73 = arith.constant 2.500000e-01 : f32
    %415 = vector.broadcast %cst_73 : f32 to vector<2x8x8xf32>
    %416 = arith.mulf %407, %415 : vector<2x8x8xf32>
    %417 = tpu.concatenate %414, %416 in 2 : vector<2x8x32xf32>, vector<2x8x8xf32> -> vector<2x8x40xf32>
    %c0_74 = arith.constant 0 : index
    %c0_75 = arith.constant 0 : index
    %c0_76 = arith.constant 0 : index
    %418 = vector.load %arg3[%c0_74, %c0_75, %c0_76] : memref<2x8x40xf32, #tpu.memory_space<vmem>>, vector<2x8x40xf32>
    tpu.vector_store %arg3[%c0_74, %c0_75, %c0_76], %417 {strides = array<i32>} : memref<2x8x40xf32, #tpu.memory_space<vmem>>, vector<2x8x40xf32>,
    return
  }
}

</mosaic_0001>

<bundles_post_ra>
// kernel: neural_cognitive_encoder.1
= control target key start
LH: loop header
LB: loop body
LE: loop exit
PB: predicated region body
PF: predicated region fallthrough
CT: control target
= control target key end

     0   :  { %8 = vsyncpa [#allocation3], 0  ;;  %s3498_s0 = inlined_call_operand.hbm [shape: f32[2,8,16], index: 0, kind: input, shape index: {}]   ;;  %s3499_s1 = inlined_call_operand.hbm [shape: f32[144,128], index: 1, kind: input, shape index: {}]   ;;  %s3500_s2 = inlined_call_operand.hbm [shape: f32[3,128], index: 2, kind: input, shape index: {}]   ;;  %s3501_s3 = inlined_call_operand.vmem [shape: f32[2,8,40], index: 3, kind: output, shape index: {}]  }
   0x1   :  { %9 = vsyncpa [#allocation5], 0  ;;  %s27_s14 = sshll.u32 %s3499_s1, 4  ;;  %s2784_s15 = smov [#allocation4]   ;;  %s28_s14 = int_to_ptr.hbm [resolvable:$true] %s27_s14 }
   0x2   :  { %s29_s16 = sshll.u32 %s2784_s15, 4  ;;  %s14_s19 = sshll.u32 %s3498_s0, 4  ;;  %s30_s16 = int_to_ptr.vmem [resolvable:$true] %s29_s16  ;;  %s15_s19 = int_to_ptr.hbm [resolvable:$true] %s14_s19 }
   0x3   :  { %s2785_s20 = smov 128   ;;  %s2786_s21 = smov 8  }
   0x4   :  { %35 = dma.hbm_to_vmem [thread:$0]  %s28_s14, 2304, %s30_s16, [#allocation5], %s2785_s20, %s2785_s20, %s2786_s21  }
   0x5   :  { %s2787_s22 = smov [#allocation2]   ;;  %s41_s26 = sshll.u32 %s3500_s2, 4  ;;  %s42_s26 = int_to_ptr.hbm [resolvable:$true] %s41_s26 }
   0x6   :  { %s16_s23 = sshll.u32 %s2787_s22, 4  ;;  %s2788_s1 = smov [#allocation6]   ;;  %s17_s23 = int_to_ptr.vmem [resolvable:$true] %s16_s23 }
   0x7   :  { %22 = dma.hbm_to_vmem [thread:$0]  %s15_s19, 256, %s17_s23, [#allocation3], %s2785_s20, %s2785_s20, %s2786_s21  }
   0x8   :  { %s43_s27 = sshll.u32 %s2788_s1, 4  ;;  %s44_s27 = int_to_ptr.vmem [resolvable:$true] %s43_s27 }
   0x9   :  { %46 = dma.hbm_to_vmem [thread:$0]  %s42_s26, 64, %s44_s27, [#allocation5]  }
   0xa   :  { %2780 = dma.done.wait [#allocation3], 256  }
   0xb   :  { %2781 = vsyncadd [#allocation3], 4294967040 }
   0xc   :  { %2782 = dma.done.wait [#allocation5], 2368  }
   0xd   :  { %2783 = vsyncadd [#allocation5], 4294964928  ;;  %v2789_v0 = vmov 1983009808   ;;  %v60_v3 = vld [vmem:[#allocation4 + $0x8] sm:$0xff]  ;;  %v59_v4 = vld [vmem:[#allocation4] sm:$0xff] }
   0xe   :  { %v84_v1 = vunpack.c.l.s4 %v2789_v0  ;;  %v78_v5 = vld [vmem:[#allocation2] sm:$0xff]  ;;  %vm81_vm0 = vcmask 1047556   ;;  %v2790_v6 = vmov 1934713408   ;;  %2504 = vmatpush.msra.mxu1 %v60_v3  ;;  %v79_v8 = vld [vmem:[#allocation2 + $0x8] sm:$0xff]  ;;  %v2837_v11 = vld [vmem:[#allocation4 + $0x28] sm:$0xff]  ;;  %178 = vmatpush.msra.mxu0 %v60_v3 }
   0xf   :  { %v106_v7 = vunpack.c.l.s4 %v2790_v6  ;;  %v80_v9 = vrot.slane %v78_v5, 4  ;;  %v91_v12 = vrot.slane %v79_v8, 4  ;;  %v2840_v16 = vld [vmem:[#allocation4 + $0x20] sm:$0xff]  ;;  %v2848_v23 = vld [vmem:[#allocation4 + $0x18] sm:$0xff]  ;;  %v2855_v29 = vld [vmem:[#allocation4 + $0x10] sm:$0xff]  ;;  %vm159_vm1 = vcmask 130048  }
  0x10   :  { %v85_v2 = vunpack.c.0.s8 %v84_v1  ;;  %2505 = vmatpush.msra.mxu1 %v59_v4  ;;  %179 = vmatpush.msra.mxu0 %v59_v4  ;;  %v2791_v44 = vmov 0.0   ;;  %v2876_v45 = vld [vmem:[#allocation6] sm:$0x7]  ;;  %s2792_s0 = smov 32   ;;  %s2793_s2 = smov 64   ;;  %vm187_vm6 = vcmask 261120  }
  0x11   :  { %v82_v14 = vsel %vm81_vm0, 0.0, %v80_v9  ;;  %v92_v18 = vsel %vm81_vm0, 0.0, %v91_v12  ;;  %v2843_v20 = vunpack.c.0.s8 %v106_v7  ;;  %v133_v46 = vperm.slane %v2876_v45, 0  ;;  %v2890_v9 = vld [vmem:[#allocation4 + $0x68] sm:$0xff]  ;;  %v2894_v12 = vld [vmem:[#allocation4 + $0x60] sm:$0xff]  ;;  %s2794_s28 = smov 96  }
  0x12   :  { %v86_v10 = vperm.slane %v78_v5, %v85_v2  ;;  %v96_v13 = vperm.slane %v79_v8, %v85_v2  ;;  %v90_v17 = vperm.slane %v82_v14, %v85_v2  ;;  %203 = vmatpush.msrb.mxu1 %v2837_v11  ;;  %498 = vmatpush.msrb.mxu0 %v2837_v11  ;;  %v2900_v14 = vld [vmem:[#allocation4 + $0x58] sm:$0xff]  ;;  %s2795_s29 = smov 88   ;;  %s2796_s30 = smov 120  }
  0x13   :  { %v100_v21 = vperm.slane %v92_v18, %v85_v2  ;;  %261 = vmatpush.msra.mxu2 %v2890_v9  ;;  %v2910_v18 = vld [vmem:[#allocation4 + $0x30] sm:$0xff]  ;;  %s2797_s4 = smov 112   ;;  %s2798_s5 = smov 80  }
  0x14   :  { %v103_v15 = vrot.slane %v86_v10, 4  ;;  %v101_v19 = vrot.slane %v96_v13, 4  ;;  %v115_v26 = vrot.slane %v90_v17, 4  ;;  %204 = vmatpush.msrb.mxu1 %v2840_v16  ;;  %499 = vmatpush.msrb.mxu0 %v2840_v16  ;;  %s2799_s6 = smov 72   ;;  %s2800_s7 = smov 104  }
  0x15   :  { %v113_v28 = vrot.slane %v100_v21, 4  ;;  %262 = vmatpush.msra.mxu2 %v2894_v12  ;;  %s2801_s8 = smov 56   ;;  %s2802_s9 = smov 40  }
  0x16   :  { %v104_v22 = vsel %vm81_vm0, %v96_v13, %v103_v15  ;;  %v102_v24 = vsel %vm81_vm0, %v101_v19, %v86_v10  ;;  %v116_v30 = vsel %vm81_vm0, %v100_v21, %v115_v26  ;;  %205 = vmatpush.msrb.mxu1 %v2848_v23  ;;  %500 = vmatpush.msrb.mxu0 %v2848_v23  ;;  %v2892_v10 = vld [vmem:[#allocation4 + $0x48] sm:$0xff]  ;;  %v2898_v13 = vld [vmem:[#allocation4 + $0x40] sm:$0xff]  ;;  %v2902_v15 = vld [vmem:[#allocation4 + $0x38] sm:$0xff]  ;;  %s2803_s10 = smov 48   ;;  %s2804_s11 = smov 16  }
  0x17   :  { %v112_v25 = vperm.slane %v104_v22, %v2843_v20  ;;  %v108_v27 = vperm.slane %v102_v24, %v2843_v20  ;;  %v114_v32 = vsel %vm81_vm0, %v113_v28, %v90_v17  ;;  %v124_v33 = vperm.slane %v116_v30, %v2843_v20  ;;  %286 = vmatpush.msra.mxu3 %v2892_v10  ;;  %v2908_v17 = vld [vmem:[#allocation4 + $0x50] sm:$0xff]  ;;  %s2805_s12 = smov 24  }
  0x18   :  { %v120_v35 = vperm.slane %v114_v32, %v2843_v20  ;;  %206 = vmatpush.msrb.mxu1 %v2855_v29  ;;  %501 = vmatpush.msrb.mxu0 %v2855_v29  ;;  %v2948_v28 = vperm.slane %v2876_v45, 1 }
  0x19   :  { %v127_v31 = vrot.slane %v112_v25, 4  ;;  %146 = vst [vmem:[#allocation1 + $0x2] ss:$4 sm:$0xff] %v112_v25  ;;  %v125_v34 = vrot.slane %v108_v27, 4  ;;  %v131_v38 = vrot.slane %v124_v33, 4  ;;  %287 = vmatpush.msra.mxu3 %v2898_v13  ;;  %263 = vmatpush.msra.mxu2 %v2900_v14 }
  0x1a   :  { %142 = vst [vmem:[#allocation1] ss:$4 sm:$0xff] %v108_v27  ;;  %v129_v39 = vrot.slane %v120_v35, 4 }
  0x1b   :  { %v128_v36 = vsel %vm81_vm0, 0.0, %v127_v31  ;;  %v126_v37 = vsel %vm81_vm0, 0.0, %v125_v34  ;;  %v132_v40 = vsel %vm81_vm0, 0.0, %v131_v38  ;;  %150 = vst [vmem:[#allocation1 + $0x20] ss:$4 sm:$0xff] %v120_v35  ;;  %288 = vmatpush.msra.mxu3 %v2902_v15  ;;  %264 = vmatpush.msra.mxu2 %v2908_v17 }
  0x1c   :  { %148 = vst [vmem:[#allocation1 + $0x3] ss:$4 sm:$0xff] %v128_v36  ;;  %v130_v41 = vsel %vm81_vm0, 0.0, %v129_v39  ;;  %265 = vmatmul.f32.vlgmr.msra.gmra.mxu2 %v2791_v44 }
  0x1d   :  { %144 = vst [vmem:[#allocation1 + $0x1] ss:$4 sm:$0xff] %v126_v37  ;;  %289 = vmatpush.msra.mxu3 %v2910_v18  ;;  %414 = vmatpush.msrb.mxu2 %v2890_v9 }
  0x1e   :  { %154 = vst [vmem:[#allocation1 + $0x22] ss:$4 sm:$0xff] %v124_v33 }
  0x1f   :  { %152 = vst [vmem:[#allocation1 + $0x21] ss:$4 sm:$0xff] %v130_v41  ;;  %440 = vmatpush.msrb.mxu3 %v2892_v10  ;;  %415 = vmatpush.msrb.mxu2 %v2894_v12 }
  0x20   :  { %156 = vst [vmem:[#allocation1 + $0x23] ss:$4 sm:$0xff] %v132_v40 }
  0x21   :  { %441 = vmatpush.msrb.mxu3 %v2898_v13  ;;  %416 = vmatpush.msrb.mxu2 %v2900_v14 }
  0x23   :  { %442 = vmatpush.msrb.mxu3 %v2902_v15  ;;  %417 = vmatpush.msrb.mxu2 %v2908_v17 }
  0x24   :  { %v157_v42 = vld.sshfl [vmem:[#allocation1] sm:$0xff pattern:$0x73625140] }
  0x25   :  { %2432 = vmatmul.msk.f32.vlgmr.msra.gmra.mxu0 %vm159_vm1, %v157_v42  ;;  %443 = vmatpush.msrb.mxu3 %v2910_v18 }
  0x26   :  { %720 = vmatpush.msra.mxu0 %v2890_v9  ;;  %593 = vmatpush.msra.mxu2 %v2892_v10 }
  0x27   :  { %v158_v43 = vld.sshfl [vmem:[#allocation1 + $0x20] sm:$0xff pattern:$0x73625140] }
  0x28   :  { %2433 = vmatmul.msk.f32.vlgmr.msra.gmra.mxu1 %vm159_vm1, %v158_v43  ;;  %721 = vmatpush.msra.mxu0 %v2894_v12 }
  0x29   :  { %345 = vmatpush.msra.mxu1 %v2837_v11  ;;  %594 = vmatpush.msra.mxu2 %v2898_v13 }
  0x2a   :  { %722 = vmatpush.msra.mxu0 %v2900_v14 }
  0x2b   :  { %346 = vmatpush.msra.mxu1 %v2840_v16  ;;  %595 = vmatpush.msra.mxu2 %v2902_v15 }
  0x2c   :  { %723 = vmatpush.msra.mxu0 %v2908_v17 }
  0x2d   :  { %347 = vmatpush.msra.mxu1 %v2848_v23  ;;  %596 = vmatpush.msra.mxu2 %v2910_v18 }
  0x2f   :  { %348 = vmatpush.msra.mxu1 %v2855_v29 }
  0x30   :  { %207 = vmatmul.f32.vlgmr.msrb.gmra.mxu1 %v2791_v44 }
  0x31   :  { %567 = vmatpush.msrb.mxu1 %v2890_v9 }
  0x33   :  { %568 = vmatpush.msrb.mxu1 %v2894_v12 }
  0x35   :  { %569 = vmatpush.msrb.mxu1 %v2900_v14 }
  0x37   :  { %570 = vmatpush.msrb.mxu1 %v2908_v17 }
  0x9f   :  { %v266_v27 = vpop.f32.mrf.mxu2 }
  0xa2   :  { %v181_v49 = vpop.f32.mrf.mxu0 }
  0xa3   :  { %v2881_v50 = vadd.f32 %v181_v49, %v133_v46 }
  0xa5   :  { %v184_v47 = vpop.f32.mrf.mxu1 }
  0xa6   :  { %v2879_v48 = vadd.f32 %v184_v47, %v133_v46 }
  0xad   :  { %v208_v51 = vpop.f32.mrf.mxu1 }
  0xae   :  { %v211_v52 = vadd.f32 %v208_v51, %v2881_v50 }
  0xb0   :  { %2543 = vtanh.f32 %v211_v52  ;;  %v2434_v54 = vmul.f32 -1.442695, %v211_v52 }
  0xb2   :  { %2545 = vpow2.f32 %v2434_v54 }
  0xb6   :  { %v2544_v53 = vpop.eup %2543 }
  0xb7   :  { %234 = vrot.lane.b32.xlu0 %v2544_v53, %s2792_s0 }
  0xb8   :  { %v2546_v55 = vpop.eup %2545 }
  0xb9   :  { %v215_v56 = vadd.f32 1.0, %v2546_v55 }
  0xbb   :  { %2547 = vrcp.f32 %v215_v56  ;;  %v227_v62 = vand.u32 2147483648, %v215_v56  ;;  %vm221_vm3 = vweird.f32 %v215_v56  ;;  %v225_v63 = vand.u32 2147483647, %v215_v56 }
  0xbd   :  { %v228_v1 = vor.u32 1.1754944e-38, %v227_v62  ;;  %vm226_vm5 = vcmp.eq.f32.partialorder %v225_v63, 8.507059e+37 }
  0xc1   :  { %v2548_v57 = vpop.eup %2547 }
  0xc2   :  { %v217_v58 = vmul.f32 %v2548_v57, %v215_v56  ;;  %vm222_vm2 = vweird.f32 %v2548_v57 }
  0xc3   :  { %vm223_vm4 = vmor %vm221_vm3, %vm222_vm2 }
  0xc4   :  { %v218_v59 = vsub.f32 1.0, %v217_v58 }
  0xc6   :  { %v219_v60 = vmul.f32 %v2548_v57, %v218_v59 }
  0xc8   :  { %v220_v61 = vadd.f32 %v2548_v57, %v219_v60 }
  0xca   :  { %v224_v0 = vsel %vm223_vm4, %v2548_v57, %v220_v61 }
  0xcb   :  { %v229_v3 = vsel %vm226_vm5, %v228_v1, %v224_v0 }
  0xcc   :  { %v232_v5 = vmul.f32 0.0, %v229_v3 }
 0x129   :  { %v235_v2 = vpop.permute.xlu0 %234 }
 0x12a   :  { %v237_v4 = vmul.f32 %v235_v2, %v229_v3 }
 0x12c   :  { %239 = vrot.lane.b32.xlu0 %v237_v4, %s2792_s0 }
 0x19e   :  { %v240_v6 = vpop.permute.xlu0 %239 }
 0x19f   :  { %v2886_v7 = vadd.f32 %v240_v6, %v232_v5 }
 0x1a1   :  { %2549 = vtanh.f32 %v2886_v7 }
 0x1a7   :  { %v2550_v8 = vpop.eup %2549 }
 0x1a8   :  { %245 = vrot.lane.b32.xlu1 %v2550_v8, %s2792_s0 }
 0x21a   :  { %v246_v19 = vpop.permute.xlu1 %245 }
 0x21b   :  { %v248_v21 = vmul.f32 %v246_v19, %v229_v3  ;;  %v378_v3 = vrot.slane %v2886_v7, 6 }
 0x21d   :  { %270 = vrot.lane.b32.xlu1 %v248_v21, %s2793_s2 }
 0x28f   :  { %v271_v22 = vpop.permute.xlu1 %270 }
 0x290   :  { %2435 = vmatmul.msk.f32.vlgmr.msra.gmra.mxu3 %vm187_vm6, %v271_v22  ;;  %2437 = vmatmul.msk.f32.vlgmr.msra.gmra.mxu1 %vm187_vm6, %v271_v22 }
 0x291   :  { %651 = vmatpush.msra.mxu3 %v2837_v11  ;;  %746 = vmatpush.msra.mxu1 %v2892_v10 }
 0x293   :  { %652 = vmatpush.msra.mxu3 %v2840_v16  ;;  %747 = vmatpush.msra.mxu1 %v2898_v13 }
 0x295   :  { %653 = vmatpush.msra.mxu3 %v2848_v23  ;;  %748 = vmatpush.msra.mxu1 %v2902_v15 }
 0x297   :  { %654 = vmatpush.msra.mxu3 %v2855_v29  ;;  %749 = vmatpush.msra.mxu1 %v2910_v18 }
 0x30d   :  { %v350_v24 = vpop.f32.mrf.mxu1 }
 0x30e   :  { %v354_v25 = vrot.slane %v350_v24, 6 }
 0x310   :  { %v356_v26 = vadd.f32 %v354_v25, %v2881_v50 }
 0x312   :  { %2551 = vtanh.f32 %v356_v26  ;;  %v2438_v35 = vmul.f32 -1.442695, %v356_v26 }
 0x313   :  { %v291_v30 = vpop.f32.mrf.mxu3 }
 0x314   :  { %v292_v31 = vadd.f32 %v291_v30, %v266_v27 }
 0x316   :  { %v295_v32 = vadd.f32 %v2948_v28, %v292_v31 }
 0x318   :  { %v2552_v33 = vpop.eup %2551  ;;  %2553 = vtanh.f32 %v295_v32  ;;  %v2436_v36 = vmul.f32 -1.442695, %v295_v32 }
 0x319   :  { %382 = vrot.lane.b32.xlu2 %v2552_v33, %s2792_s0  ;;  %2555 = vpow2.f32 %v2438_v35 }
 0x31a   :  { %2557 = vpow2.f32 %v2436_v36 }
 0x31e   :  { %v2554_v34 = vpop.eup %2553 }
 0x31f   :  { %v2556_v37 = vpop.eup %2555 }
 0x320   :  { %v360_v38 = vadd.f32 1.0, %v2556_v37  ;;  %v2558_v39 = vpop.eup %2557 }
 0x321   :  { %318 = vrot.lane.b32.xlu2 %v2554_v34, %s2792_s0  ;;  %v299_v40 = vadd.f32 1.0, %v2558_v39 }
 0x322   :  { %2559 = vrcp.f32 %v360_v38  ;;  %v372_v51 = vand.u32 2147483648, %v360_v38  ;;  %vm366_vm8 = vweird.f32 %v360_v38  ;;  %v370_v52 = vand.u32 2147483647, %v360_v38 }
 0x323   :  { %2561 = vrcp.f32 %v299_v40  ;;  %v311_v60 = vand.u32 2147483648, %v299_v40  ;;  %vm305_vm12 = vweird.f32 %v299_v40  ;;  %v309_v61 = vand.u32 2147483647, %v299_v40 }
 0x324   :  { %v373_v55 = vor.u32 1.1754944e-38, %v372_v51  ;;  %vm371_vm10 = vcmp.eq.f32.partialorder %v370_v52, 8.507059e+37 }
 0x325   :  { %v312_v63 = vor.u32 1.1754944e-38, %v311_v60  ;;  %vm310_vm14 = vcmp.eq.f32.partialorder %v309_v61, 8.507059e+37 }
 0x328   :  { %v2560_v41 = vpop.eup %2559 }
 0x329   :  { %v362_v42 = vmul.f32 %v2560_v41, %v360_v38  ;;  %v2562_v44 = vpop.eup %2561  ;;  %vm367_vm7 = vweird.f32 %v2560_v41 }
 0x32a   :  { %v301_v46 = vmul.f32 %v2562_v44, %v299_v40  ;;  %vm368_vm9 = vmor %vm366_vm8, %vm367_vm7  ;;  %vm306_vm11 = vweird.f32 %v2562_v44 }
 0x32b   :  { %v363_v43 = vsub.f32 1.0, %v362_v42  ;;  %vm307_vm13 = vmor %vm305_vm12, %vm306_vm11 }
 0x32c   :  { %v302_v49 = vsub.f32 1.0, %v301_v46 }
 0x32d   :  { %v364_v45 = vmul.f32 %v2560_v41, %v363_v43 }
 0x32e   :  { %v303_v54 = vmul.f32 %v2562_v44, %v302_v49 }
 0x32f   :  { %v365_v47 = vadd.f32 %v2560_v41, %v364_v45 }
 0x330   :  { %v304_v59 = vadd.f32 %v2562_v44, %v303_v54 }
 0x331   :  { %v369_v53 = vsel %vm368_vm9, %v2560_v41, %v365_v47 }
 0x332   :  { %v374_v57 = vsel %vm371_vm10, %v373_v55, %v369_v53  ;;  %v308_v62 = vsel %vm307_vm13, %v2562_v44, %v304_v59 }
 0x333   :  { %v313_v1 = vsel %vm310_vm14, %v312_v63, %v308_v62  ;;  %v380_v4 = vmul.f32 %v378_v3, %v374_v57 }
 0x334   :  { %v316_v8 = vmul.f32 0.0, %v313_v1 }
 0x373   :  { %v383_v56 = vpop.permute.xlu2 %382 }
 0x374   :  { %v385_v58 = vmul.f32 %v383_v56, %v374_v57 }
 0x376   :  { %387 = vrot.lane.b32.xlu0 %v385_v58, %s2792_s0 }
 0x37b   :  { %v319_v0 = vpop.permute.xlu2 %318 }
 0x37c   :  { %v321_v2 = vmul.f32 %v319_v0, %v313_v1 }
 0x37e   :  { %323 = vrot.lane.b32.xlu1 %v321_v2, %s2792_s0 }
 0x3e8   :  { %v388_v5 = vpop.permute.xlu0 %387 }
 0x3e9   :  { %v2956_v6 = vadd.f32 %v388_v5, %v380_v4 }
 0x3eb   :  { %2563 = vtanh.f32 %v2956_v6 }
 0x3f0   :  { %v324_v19 = vpop.permute.xlu1 %323 }
 0x3f1   :  { %v2564_v21 = vpop.eup %2563  ;;  %v2959_v22 = vadd.f32 %v324_v19, %v316_v8 }
 0x3f2   :  { %393 = vrot.lane.b32.xlu2 %v2564_v21, %s2792_s0 }
 0x3f3   :  { %2565 = vtanh.f32 %v2959_v22 }
 0x3f9   :  { %v2566_v24 = vpop.eup %2565 }
 0x3fa   :  { %329 = vrot.lane.b32.xlu0 %v2566_v24, %s2792_s0 }
 0x44c   :  { %v394_v25 = vpop.permute.xlu2 %393 }
 0x44d   :  { %v396_v7 = vmul.f32 %v394_v25, %v374_v57  ;;  %v531_v25 = vrot.slane %v2956_v6, 6 }
 0x44f   :  { %v423_v26 = vrot.slane %v396_v7, 2 }
 0x451   :  { %424 = vrot.lane.b32.xlu1 %v423_v26, %s2793_s2 }
 0x46c   :  { %v330_v27 = vpop.permute.xlu0 %329 }
 0x46d   :  { %v2965_v30 = vmul.f32 %v330_v27, %v313_v1 }
 0x46f   :  { %398 = vrot.lane.b32.xlu2 %v2965_v30, %s2793_s2 }
 0x4c3   :  { %v425_v31 = vpop.permute.xlu1 %424 }
 0x4c4   :  { %2440 = vmatmul.msk.f32.vlgmr.msrb.gmra.mxu3 %vm187_vm6, %v425_v31  ;;  %2442 = vmatmul.msk.f32.vlgmr.msrb.gmra.mxu0 %vm187_vm6, %v425_v31 }
 0x4c5   :  { %895 = vmatpush.msrb.mxu0 %v2892_v10  ;;  %870 = vmatpush.msrb.mxu3 %v2890_v9 }
 0x4c7   :  { %896 = vmatpush.msrb.mxu0 %v2898_v13  ;;  %871 = vmatpush.msrb.mxu3 %v2894_v12 }
 0x4c9   :  { %v399_v32 = vpop.permute.xlu2 %398  ;;  %897 = vmatpush.msrb.mxu0 %v2902_v15  ;;  %872 = vmatpush.msrb.mxu3 %v2900_v14 }
 0x4ca   :  { %2439 = vmatmul.msk.f32.vlgmr.msrb.gmra.mxu2 %vm187_vm6, %v399_v32 }
 0x4cb   :  { %804 = vmatpush.msrb.mxu2 %v2837_v11  ;;  %898 = vmatpush.msrb.mxu0 %v2910_v18 }
 0x4cc   :  { %873 = vmatpush.msrb.mxu3 %v2908_v17 }
 0x4cd   :  { %805 = vmatpush.msrb.mxu2 %v2840_v16 }
 0x4cf   :  { %806 = vmatpush.msrb.mxu2 %v2848_v23 }
 0x4d1   :  { %807 = vmatpush.msrb.mxu2 %v2855_v29 }
 0x541   :  { %v503_v33 = vpop.f32.mrf.mxu0 }
 0x542   :  { %v507_v34 = vrot.slane %v503_v33, 4 }
 0x544   :  { %v509_v35 = vadd.f32 %v507_v34, %v2881_v50 }
 0x546   :  { %2567 = vtanh.f32 %v509_v35  ;;  %v2443_v42 = vmul.f32 -1.442695, %v509_v35 }
 0x547   :  { %v445_v37 = vpop.f32.mrf.mxu3 }
 0x54c   :  { %v2568_v36 = vpop.eup %2567 }
 0x54d   :  { %535 = vrot.lane.b32.xlu0 %v2568_v36, %s2792_s0  ;;  %v419_v38 = vpop.f32.mrf.mxu2 }
 0x54e   :  { %v446_v39 = vadd.f32 %v445_v37, %v419_v38 }
 0x550   :  { %v448_v40 = vadd.f32 %v446_v39, %v2948_v28 }
 0x552   :  { %2569 = vtanh.f32 %v448_v40  ;;  %v2441_v44 = vmul.f32 -1.442695, %v448_v40 }
 0x553   :  { %2571 = vpow2.f32 %v2443_v42 }
 0x554   :  { %2573 = vpow2.f32 %v2441_v44 }
 0x558   :  { %v2570_v41 = vpop.eup %2569 }
 0x559   :  { %471 = vrot.lane.b32.xlu1 %v2570_v41, %s2792_s0  ;;  %v2572_v43 = vpop.eup %2571 }
 0x55a   :  { %v513_v45 = vadd.f32 1.0, %v2572_v43  ;;  %v2574_v46 = vpop.eup %2573 }
 0x55b   :  { %v452_v49 = vadd.f32 1.0, %v2574_v46 }
 0x55c   :  { %2575 = vrcp.f32 %v513_v45  ;;  %v525_v57 = vand.u32 2147483648, %v513_v45  ;;  %vm519_vm2 = vweird.f32 %v513_v45  ;;  %v523_v58 = vand.u32 2147483647, %v513_v45 }
 0x55d   :  { %2577 = vrcp.f32 %v452_v49  ;;  %v464_v3 = vand.u32 2147483648, %v452_v49  ;;  %vm458_vm7 = vweird.f32 %v452_v49  ;;  %v462_v4 = vand.u32 2147483647, %v452_v49 }
 0x55e   :  { %v526_v61 = vor.u32 1.1754944e-38, %v525_v57  ;;  %vm524_vm4 = vcmp.eq.f32.partialorder %v523_v58, 8.507059e+37 }
 0x55f   :  { %v465_v8 = vor.u32 1.1754944e-38, %v464_v3  ;;  %vm463_vm9 = vcmp.eq.f32.partialorder %v462_v4, 8.507059e+37 }
 0x562   :  { %v2576_v47 = vpop.eup %2575 }
 0x563   :  { %v515_v51 = vmul.f32 %v2576_v47, %v513_v45  ;;  %v2578_v54 = vpop.eup %2577  ;;  %vm520_vm15 = vweird.f32 %v2576_v47 }
 0x564   :  { %v454_v56 = vmul.f32 %v2578_v54, %v452_v49  ;;  %vm521_vm3 = vmor %vm519_vm2, %vm520_vm15  ;;  %vm459_vm5 = vweird.f32 %v2578_v54 }
 0x565   :  { %v516_v52 = vsub.f32 1.0, %v515_v51  ;;  %vm460_vm8 = vmor %vm458_vm7, %vm459_vm5  ;;  %vm1415_vm5 = vcmask 1043456  }
 0x566   :  { %v455_v60 = vsub.f32 1.0, %v454_v56 }
 0x567   :  { %v517_v53 = vmul.f32 %v2576_v47, %v516_v52 }
 0x568   :  { %v456_v1 = vmul.f32 %v2578_v54, %v455_v60 }
 0x569   :  { %v518_v55 = vadd.f32 %v2576_v47, %v517_v53 }
 0x56a   :  { %v457_v2 = vadd.f32 %v2578_v54, %v456_v1 }
 0x56b   :  { %v522_v59 = vsel %vm521_vm3, %v2576_v47, %v518_v55 }
 0x56c   :  { %v527_v62 = vsel %vm524_vm4, %v526_v61, %v522_v59  ;;  %v461_v5 = vsel %vm460_vm8, %v2578_v54, %v457_v2  ;;  %vm1413_vm4 = vcmask 1041408  }
 0x56d   :  { %v466_v21 = vsel %vm463_vm9, %v465_v8, %v461_v5  ;;  %v533_v7 = vmul.f32 %v531_v25, %v527_v62 }
 0x56e   :  { %v469_v32 = vmul.f32 %v466_v21, %v2959_v22 }
 0x5bf   :  { %v536_v63 = vpop.permute.xlu0 %535 }
 0x5c0   :  { %v538_v0 = vmul.f32 %v536_v63, %v527_v62 }
 0x5c2   :  { %540 = vrot.lane.b32.xlu2 %v538_v0, %s2792_s0 }
 0x5cb   :  { %v472_v19 = vpop.permute.xlu1 %471 }
 0x5cc   :  { %v474_v24 = vmul.f32 %v472_v19, %v466_v21 }
 0x5ce   :  { %476 = vrot.lane.b32.xlu0 %v474_v24, %s2792_s0 }
 0x61c   :  { %v541_v26 = vpop.permute.xlu2 %540 }
 0x61d   :  { %v2991_v27 = vadd.f32 %v541_v26, %v533_v7 }
 0x61f   :  { %2579 = vtanh.f32 %v2991_v27 }
 0x625   :  { %v2580_v31 = vpop.eup %2579 }
 0x626   :  { %546 = vrot.lane.b32.xlu1 %v2580_v31, %s2792_s0 }
 0x640   :  { %v477_v33 = vpop.permute.xlu0 %476 }
 0x641   :  { %v2996_v34 = vadd.f32 %v477_v33, %v469_v32 }
 0x643   :  { %2581 = vtanh.f32 %v2996_v34 }
 0x649   :  { %v2582_v35 = vpop.eup %2581 }
 0x64a   :  { %482 = vrot.lane.b32.xlu2 %v2582_v35, %s2792_s0 }
 0x698   :  { %v547_v6 = vpop.permute.xlu1 %546 }
 0x699   :  { %v549_v36 = vmul.f32 %v547_v6, %v527_v62  ;;  %v684_v6 = vrot.slane %v2991_v27, 6 }
 0x69b   :  { %v576_v37 = vrot.slane %v549_v36, 4 }
 0x69d   :  { %577 = vrot.lane.b32.xlu0 %v576_v37, %s2793_s2 }
 0x6a4   :  { %v483_v38 = vpop.permute.xlu2 %482 }
 0x6a5   :  { %v3001_v39 = vmul.f32 %v483_v38, %v466_v21 }
 0x6a7   :  { %551 = vrot.lane.b32.xlu1 %v3001_v39, %s2793_s2 }
 0x70f   :  { %v578_v22 = vpop.permute.xlu0 %577 }
 0x710   :  { %2445 = vmatmul.msk.f32.vlgmr.msra.gmra.mxu2 %vm187_vm6, %v578_v22  ;;  %2447 = vmatmul.msk.f32.vlgmr.msra.gmra.mxu3 %vm187_vm6, %v578_v22 }
 0x711   :  { %1048 = vmatpush.msra.mxu3 %v2892_v10  ;;  %1022 = vmatpush.msra.mxu2 %v2890_v9 }
 0x713   :  { %1049 = vmatpush.msra.mxu3 %v2898_v13  ;;  %1023 = vmatpush.msra.mxu2 %v2894_v12 }
 0x715   :  { %1050 = vmatpush.msra.mxu3 %v2902_v15  ;;  %1024 = vmatpush.msra.mxu2 %v2900_v14 }
 0x717   :  { %1051 = vmatpush.msra.mxu3 %v2910_v18  ;;  %1025 = vmatpush.msra.mxu2 %v2908_v17 }
 0x719   :  { %v552_v40 = vpop.permute.xlu1 %551 }
 0x71a   :  { %2444 = vmatmul.msk.f32.vlgmr.msrb.gmra.mxu1 %vm187_vm6, %v552_v40 }
 0x71b   :  { %953 = vmatpush.msrb.mxu1 %v2837_v11 }
 0x71d   :  { %954 = vmatpush.msrb.mxu1 %v2840_v16 }
 0x71f   :  { %955 = vmatpush.msrb.mxu1 %v2848_v23 }
 0x721   :  { %956 = vmatpush.msrb.mxu1 %v2855_v29 }
 0x793   :  { %v656_v41 = vpop.f32.mrf.mxu3  ;;  %v598_v44 = vpop.f32.mrf.mxu2 }
 0x794   :  { %v660_v42 = vrot.slane %v656_v41, 2 }
 0x796   :  { %v662_v43 = vadd.f32 %v660_v42, %v2881_v50 }
 0x797   :  { %v572_v45 = vpop.f32.mrf.mxu1 }
 0x798   :  { %2583 = vtanh.f32 %v662_v43  ;;  %v599_v46 = vadd.f32 %v598_v44, %v572_v45  ;;  %v2448_v52 = vmul.f32 -1.442695, %v662_v43 }
 0x79a   :  { %v601_v47 = vadd.f32 %v599_v46, %v2948_v28  ;;  %v1400_v46 = vrot.slane %v3001_v39, 6 }
 0x79c   :  { %2585 = vtanh.f32 %v601_v47  ;;  %v2446_v56 = vmul.f32 -1.442695, %v601_v47 }
 0x79d   :  { %2587 = vpow2.f32 %v2448_v52 }
 0x79e   :  { %v2584_v49 = vpop.eup %2583 }
 0x79f   :  { %688 = vrot.lane.b32.xlu2 %v2584_v49, %s2792_s0 }
 0x7a2   :  { %v2586_v51 = vpop.eup %2585 }
 0x7a3   :  { %624 = vrot.lane.b32.xlu0 %v2586_v51, %s2792_s0  ;;  %v2588_v53 = vpop.eup %2587  ;;  %v1414_v51 = vsel %vm1413_vm4, %v2965_v30, %v1400_v46 }
 0x7a4   :  { %v666_v54 = vadd.f32 1.0, %v2588_v53 }
 0x7a6   :  { %2589 = vrcp.f32 %v666_v54  ;;  %v678_v61 = vand.u32 2147483648, %v666_v54  ;;  %vm672_vm11 = vweird.f32 %v666_v54  ;;  %v676_v62 = vand.u32 2147483647, %v666_v54 }
 0x7a7   :  { %2591 = vpow2.f32 %v2446_v56 }
 0x7a8   :  { %v679_v1 = vor.u32 1.1754944e-38, %v678_v61  ;;  %vm677_vm13 = vcmp.eq.f32.partialorder %v676_v62, 8.507059e+37 }
 0x7ac   :  { %v2590_v55 = vpop.eup %2589 }
 0x7ad   :  { %v668_v50 = vmul.f32 %v2590_v55, %v666_v54  ;;  %v2592_v59 = vpop.eup %2591  ;;  %vm673_vm10 = vweird.f32 %v2590_v55 }
 0x7ae   :  { %v605_v63 = vadd.f32 1.0, %v2592_v59  ;;  %vm674_vm12 = vmor %vm672_vm11, %vm673_vm10 }
 0x7af   :  { %v669_v57 = vsub.f32 1.0, %v668_v50 }
 0x7b0   :  { %2593 = vrcp.f32 %v605_v63  ;;  %v617_v25 = vand.u32 2147483648, %v605_v63  ;;  %vm611_vm15 = vweird.f32 %v605_v63  ;;  %v615_v7 = vand.u32 2147483647, %v605_v63 }
 0x7b1   :  { %v670_v58 = vmul.f32 %v2590_v55, %v669_v57 }
 0x7b2   :  { %v618_v31 = vor.u32 1.1754944e-38, %v617_v25  ;;  %vm616_vm3 = vcmp.eq.f32.partialorder %v615_v7, 8.507059e+37 }
 0x7b3   :  { %v671_v60 = vadd.f32 %v2590_v55, %v670_v58 }
 0x7b5   :  { %v675_v0 = vsel %vm674_vm12, %v2590_v55, %v671_v60 }
 0x7b6   :  { %v680_v3 = vsel %vm677_vm13, %v679_v1, %v675_v0  ;;  %v2594_v5 = vpop.eup %2593 }
 0x7b7   :  { %v607_v8 = vmul.f32 %v2594_v5, %v605_v63  ;;  %vm612_vm14 = vweird.f32 %v2594_v5  ;;  %v686_v36 = vmul.f32 %v684_v6, %v680_v3 }
 0x7b8   :  { %vm613_vm2 = vmor %vm611_vm15, %vm612_vm14  ;;  %vm1417_vm15 = vcmask 1045504  }
 0x7b9   :  { %v608_v19 = vsub.f32 1.0, %v607_v8 }
 0x7bb   :  { %v609_v21 = vmul.f32 %v2594_v5, %v608_v19 }
 0x7bd   :  { %v610_v24 = vadd.f32 %v2594_v5, %v609_v21 }
 0x7bf   :  { %v614_v26 = vsel %vm613_vm2, %v2594_v5, %v610_v24 }
 0x7c0   :  { %v619_v33 = vsel %vm616_vm3, %v618_v31, %v614_v26 }
 0x7c1   :  { %v622_v22 = vmul.f32 %v619_v33, %v2996_v34 }
 0x7f9   :  { %v689_v2 = vpop.permute.xlu2 %688 }
 0x7fa   :  { %v691_v4 = vmul.f32 %v689_v2, %v680_v3 }
 0x7fc   :  { %693 = vrot.lane.b32.xlu1 %v691_v4, %s2792_s0 }
 0x815   :  { %v625_v32 = vpop.permute.xlu0 %624 }
 0x816   :  { %v627_v35 = vmul.f32 %v625_v32, %v619_v33 }
 0x818   :  { %629 = vrot.lane.b32.xlu2 %v627_v35, %s2792_s0 }
 0x86e   :  { %v694_v37 = vpop.permute.xlu1 %693 }
 0x86f   :  { %v3027_v38 = vadd.f32 %v694_v37, %v686_v36 }
 0x871   :  { %2595 = vtanh.f32 %v3027_v38 }
 0x872   :  { %v630_v40 = vpop.permute.xlu2 %629 }
 0x873   :  { %v3031_v41 = vadd.f32 %v630_v40, %v622_v22 }
 0x875   :  { %2597 = vtanh.f32 %v3031_v41 }
 0x877   :  { %v2596_v42 = vpop.eup %2595 }
 0x878   :  { %699 = vrot.lane.b32.xlu0 %v2596_v42, %s2792_s0  ;;  %v834_v42 = vrot.slane %v3027_v38, 6 }
 0x87b   :  { %v2598_v43 = vpop.eup %2597 }
 0x87c   :  { %635 = vrot.lane.b32.xlu1 %v2598_v43, %s2792_s0 }
 0x8ea   :  { %v700_v27 = vpop.permute.xlu0 %699 }
 0x8eb   :  { %v702_v44 = vmul.f32 %v700_v27, %v680_v3 }
 0x8ed   :  { %v729_v45 = vrot.slane %v702_v44, 6 }
 0x8ee   :  { %v636_v47 = vpop.permute.xlu1 %635 }
 0x8ef   :  { %v638_v49 = vmul.f32 %v636_v47, %v619_v33  ;;  %730 = vrot.lane.b32.xlu2 %v729_v45, %s2793_s2 }
 0x8f1   :  { %v1402_v34 = vrot.slane %v638_v49, 4  ;;  %704 = vrot.lane.b32.xlu0 %v638_v49, %s2793_s2 }
 0x8f3   :  { %v3042_v52 = vsel %vm1415_vm5, %v1414_v51, %v1402_v34 }
 0x949   :  { %v731_v53 = vpop.permute.xlu2 %730 }
 0x94a   :  { %2450 = vmatmul.msk.f32.vlgmr.msra.gmra.mxu1 %vm187_vm6, %v731_v53  ;;  %2452 = vmatmul.msk.f32.vlgmr.msrb.gmra.mxu2 %vm187_vm6, %v731_v53 }
 0x94b   :  { %1201 = vmatpush.msrb.mxu2 %v2892_v10  ;;  %1175 = vmatpush.msra.mxu1 %v2890_v9 }
 0x94d   :  { %1202 = vmatpush.msrb.mxu2 %v2898_v13  ;;  %1176 = vmatpush.msra.mxu1 %v2894_v12 }
 0x94f   :  { %1203 = vmatpush.msrb.mxu2 %v2902_v15  ;;  %1177 = vmatpush.msra.mxu1 %v2900_v14 }
 0x951   :  { %1204 = vmatpush.msrb.mxu2 %v2910_v18  ;;  %1178 = vmatpush.msra.mxu1 %v2908_v17 }
 0x963   :  { %v705_v30 = vpop.permute.xlu0 %704 }
 0x964   :  { %2449 = vmatmul.msk.f32.vlgmr.msra.gmra.mxu0 %vm187_vm6, %v705_v30 }
 0x965   :  { %1106 = vmatpush.msra.mxu0 %v2837_v11 }
 0x967   :  { %1107 = vmatpush.msra.mxu0 %v2840_v16 }
 0x969   :  { %1108 = vmatpush.msra.mxu0 %v2848_v23 }
 0x96b   :  { %1109 = vmatpush.msra.mxu0 %v2855_v29 }
 0x9c7   :  { %v751_v50 = vpop.f32.mrf.mxu1 }
 0x9cd   :  { %v809_v39 = vpop.f32.mrf.mxu2 }
 0x9ce   :  { %v812_v54 = vadd.f32 %v809_v39, %v2879_v48 }
 0x9d0   :  { %2599 = vtanh.f32 %v812_v54  ;;  %v2453_v16 = vmul.f32 -1.442695, %v812_v54 }
 0x9d6   :  { %v2600_v55 = vpop.eup %2599 }
 0x9d7   :  { %838 = vrot.lane.b32.xlu2 %v2600_v55, %s2792_s0  ;;  %v2703_v55 = vld [vmem:[#allocation4 + $0x28] sm:$0xff] }
 0x9e1   :  { %v725_v56 = vpop.f32.mrf.mxu0 }
 0x9e2   :  { %v752_v57 = vadd.f32 %v751_v50, %v725_v56 }
 0x9e4   :  { %v754_v58 = vadd.f32 %v752_v57, %v2948_v28 }
 0x9e6   :  { %2601 = vtanh.f32 %v754_v58  ;;  %v2451_v8 = vmul.f32 -1.442695, %v754_v58 }
 0x9e7   :  { %2603 = vpow2.f32 %v2453_v16 }
 0x9ec   :  { %v2602_v11 = vpop.eup %2601 }
 0x9ed   :  { %777 = vrot.lane.b32.xlu1 %v2602_v11, %s2792_s0  ;;  %v2604_v23 = vpop.eup %2603 }
 0x9ee   :  { %v816_v29 = vadd.f32 1.0, %v2604_v23 }
 0x9f0   :  { %2605 = vrcp.f32 %v816_v29  ;;  %v828_v0 = vand.u32 2147483648, %v816_v29  ;;  %vm822_vm8 = vweird.f32 %v816_v29  ;;  %v826_v1 = vand.u32 2147483647, %v816_v29 }
 0x9f1   :  { %2607 = vpow2.f32 %v2451_v8 }
 0x9f2   :  { %v829_v3 = vor.u32 1.1754944e-38, %v828_v0  ;;  %vm827_vm10 = vcmp.eq.f32.partialorder %v826_v1, 8.507059e+37 }
 0x9f6   :  { %v2606_v59 = vpop.eup %2605 }
 0x9f7   :  { %v818_v60 = vmul.f32 %v2606_v59, %v816_v29  ;;  %vm823_vm7 = vweird.f32 %v2606_v59  ;;  %v2608_v21 = vpop.eup %2607 }
 0x9f8   :  { %vm824_vm9 = vmor %vm822_vm8, %vm823_vm7  ;;  %v758_v24 = vadd.f32 1.0, %v2608_v21 }
 0x9f9   :  { %v819_v61 = vsub.f32 1.0, %v818_v60 }
 0x9fa   :  { %2609 = vrcp.f32 %v758_v24  ;;  %v770_v33 = vand.u32 2147483648, %v758_v24  ;;  %vm764_vm12 = vweird.f32 %v758_v24  ;;  %v768_v35 = vand.u32 2147483647, %v758_v24 }
 0x9fb   :  { %v820_v62 = vmul.f32 %v2606_v59, %v819_v61 }
 0x9fc   :  { %v771_v36 = vor.u32 1.1754944e-38, %v770_v33  ;;  %vm769_vm14 = vcmp.eq.f32.partialorder %v768_v35, 8.507059e+37 }
 0x9fd   :  { %v821_v63 = vadd.f32 %v2606_v59, %v820_v62 }
 0x9ff   :  { %v825_v2 = vsel %vm824_vm9, %v2606_v59, %v821_v63 }
 0xa00   :  { %v830_v5 = vsel %vm827_vm10, %v829_v3, %v825_v2  ;;  %v2610_v25 = vpop.eup %2609 }
 0xa01   :  { %v760_v7 = vmul.f32 %v2610_v25, %v758_v24  ;;  %vm765_vm11 = vweird.f32 %v2610_v25  ;;  %v836_v43 = vmul.f32 %v834_v42, %v830_v5 }
 0xa02   :  { %vm766_vm13 = vmor %vm764_vm12, %vm765_vm11 }
 0xa03   :  { %v761_v26 = vsub.f32 1.0, %v760_v7 }
 0xa05   :  { %v762_v31 = vmul.f32 %v2610_v25, %v761_v26 }
 0xa07   :  { %v763_v32 = vadd.f32 %v2610_v25, %v762_v31 }
 0xa09   :  { %v767_v6 = vsel %vm766_vm13, %v2610_v25, %v763_v32 }
 0xa0a   :  { %v772_v22 = vsel %vm769_vm14, %v771_v36, %v767_v6 }
 0xa0b   :  { %v775_v46 = vmul.f32 %v772_v22, %v3031_v41 }
 0xa31   :  { %v839_v4 = vpop.permute.xlu2 %838 }
 0xa32   :  { %v841_v19 = vmul.f32 %v839_v4, %v830_v5 }
 0xa34   :  { %843 = vrot.lane.b32.xlu1 %v841_v19, %s2792_s0 }
 0xa5f   :  { %v778_v37 = vpop.permute.xlu1 %777 }
 0xa60   :  { %v780_v40 = vmul.f32 %v778_v37, %v772_v22 }
 0xa62   :  { %782 = vrot.lane.b32.xlu0 %v780_v40, %s2792_s0 }
 0xaa6   :  { %v844_v27 = vpop.permute.xlu1 %843 }
 0xaa7   :  { %v3066_v44 = vadd.f32 %v844_v27, %v836_v43 }
 0xaa9   :  { %2611 = vtanh.f32 %v3066_v44  ;;  %v986_v40 = vrot.slane %v3066_v44, 6 }
 0xaaf   :  { %v2612_v45 = vpop.eup %2611 }
 0xab0   :  { %849 = vrot.lane.b32.xlu0 %v2612_v45, %s2792_s0 }
 0xad4   :  { %v783_v47 = vpop.permute.xlu0 %782 }
 0xad5   :  { %v3071_v49 = vadd.f32 %v783_v47, %v775_v46 }
 0xad7   :  { %2613 = vtanh.f32 %v3071_v49 }
 0xadd   :  { %v2614_v34 = vpop.eup %2613 }
 0xade   :  { %788 = vrot.lane.b32.xlu2 %v2614_v34, %s2792_s0 }
 0xb22   :  { %v850_v38 = vpop.permute.xlu0 %849 }
 0xb23   :  { %v852_v51 = vmul.f32 %v850_v38, %v830_v5 }
 0xb25   :  { %879 = vrot.lane.b32.xlu2 %v852_v51, %s2793_s2 }
 0xb38   :  { %v789_v53 = vpop.permute.xlu2 %788 }
 0xb39   :  { %v791_v30 = vmul.f32 %v789_v53, %v772_v22 }
 0xb3b   :  { %v1404_v39 = vrot.slane %v791_v30, 2  ;;  %854 = vrot.lane.b32.xlu1 %v791_v30, %s2793_s2 }
 0xb3d   :  { %v3079_v41 = vsel %vm1417_vm15, %v3042_v52, %v1404_v39 }
 0xb7f   :  { %v880_v54 = vpop.permute.xlu2 %879 }
 0xb80   :  { %2455 = vmatmul.msk.f32.vlgmr.msrb.gmra.mxu0 %vm187_vm6, %v880_v54  ;;  %2457 = vmatmul.msk.f32.vlgmr.msrb.gmra.mxu1 %vm187_vm6, %v880_v54 }
 0xb81   :  { %1354 = vmatpush.msrb.mxu1 %v2892_v10  ;;  %1328 = vmatpush.msrb.mxu0 %v2890_v9  ;;  %v2704_v10 = vld [vmem:[#allocation4 + $0x20] sm:$0xff]  ;;  %v2705_v9 = vld [vmem:[#allocation4 + $0x18] sm:$0xff] }
 0xb83   :  { %1355 = vmatpush.msrb.mxu1 %v2898_v13  ;;  %1329 = vmatpush.msrb.mxu0 %v2894_v12  ;;  %v2706_v13 = vld [vmem:[#allocation4 + $0x10] sm:$0xff] }
 0xb85   :  { %1356 = vmatpush.msrb.mxu1 %v2902_v15  ;;  %1330 = vmatpush.msrb.mxu0 %v2900_v14 }
 0xb87   :  { %1357 = vmatpush.msrb.mxu1 %v2910_v18  ;;  %1331 = vmatpush.msrb.mxu0 %v2908_v17 }
 0xbad   :  { %v855_v52 = vpop.permute.xlu1 %854 }
 0xbae   :  { %2454 = vmatmul.msk.f32.vlgmr.msrb.gmra.mxu3 %vm187_vm6, %v855_v52 }
 0xbaf   :  { %1259 = vmatpush.msrb.mxu3 %v2703_v55 }
 0xbb1   :  { %1260 = vmatpush.msrb.mxu3 %v2704_v10 }
 0xbb3   :  { %1261 = vmatpush.msrb.mxu3 %v2705_v9 }
 0xbb5   :  { %1262 = vmatpush.msrb.mxu3 %v2706_v13 }
 0xbfd   :  { %v958_v12 = vpop.f32.mrf.mxu1  ;;  %v900_v17 = vpop.f32.mrf.mxu0 }
 0xbfe   :  { %v962_v50 = vrot.slane %v958_v12, 6 }
 0xc00   :  { %v964_v15 = vadd.f32 %v962_v50, %v2879_v48 }
 0xc02   :  { %2615 = vtanh.f32 %v964_v15  ;;  %v2458_v11 = vmul.f32 -1.442695, %v964_v15 }
 0xc08   :  { %v2616_v14 = vpop.eup %2615 }
 0xc09   :  { %990 = vrot.lane.b32.xlu0 %v2616_v14, %s2792_s0 }
 0xc31   :  { %v875_v18 = vpop.f32.mrf.mxu3 }
 0xc32   :  { %v901_v56 = vadd.f32 %v900_v17, %v875_v18 }
 0xc34   :  { %v903_v57 = vadd.f32 %v901_v56, %v2948_v28 }
 0xc36   :  { %2617 = vtanh.f32 %v903_v57  ;;  %v2456_v8 = vmul.f32 -1.442695, %v903_v57 }
 0xc37   :  { %2619 = vpow2.f32 %v2458_v11 }
 0xc3c   :  { %v2618_v58 = vpop.eup %2617 }
 0xc3d   :  { %926 = vrot.lane.b32.xlu1 %v2618_v58, %s2792_s0  ;;  %v2620_v16 = vpop.eup %2619 }
 0xc3e   :  { %v968_v23 = vadd.f32 1.0, %v2620_v16 }
 0xc40   :  { %2621 = vrcp.f32 %v968_v23  ;;  %v980_v63 = vand.u32 2147483648, %v968_v23  ;;  %vm974_vm3 = vweird.f32 %v968_v23  ;;  %v978_v0 = vand.u32 2147483647, %v968_v23 }
 0xc41   :  { %2623 = vpow2.f32 %v2456_v8 }
 0xc42   :  { %v981_v2 = vor.u32 1.1754944e-38, %v980_v63  ;;  %vm979_vm8 = vcmp.eq.f32.partialorder %v978_v0, 8.507059e+37 }
 0xc46   :  { %v2622_v29 = vpop.eup %2621 }
 0xc47   :  { %v970_v59 = vmul.f32 %v2622_v29, %v968_v23  ;;  %vm975_vm2 = vweird.f32 %v2622_v29  ;;  %v2624_v19 = vpop.eup %2623 }
 0xc48   :  { %vm976_vm7 = vmor %vm974_vm3, %vm975_vm2  ;;  %v907_v21 = vadd.f32 1.0, %v2624_v19 }
 0xc49   :  { %v971_v60 = vsub.f32 1.0, %v970_v59 }
 0xc4a   :  { %2625 = vrcp.f32 %v907_v21  ;;  %v919_v32 = vand.u32 2147483648, %v907_v21  ;;  %vm913_vm10 = vweird.f32 %v907_v21  ;;  %v917_v33 = vand.u32 2147483647, %v907_v21 }
 0xc4b   :  { %v972_v61 = vmul.f32 %v2622_v29, %v971_v60 }
 0xc4c   :  { %v920_v6 = vor.u32 1.1754944e-38, %v919_v32  ;;  %vm918_vm12 = vcmp.eq.f32.partialorder %v917_v33, 8.507059e+37 }
 0xc4d   :  { %v973_v62 = vadd.f32 %v2622_v29, %v972_v61 }
 0xc4f   :  { %v977_v1 = vsel %vm976_vm7, %v2622_v29, %v973_v62 }
 0xc50   :  { %v982_v4 = vsel %vm979_vm8, %v981_v2, %v977_v1  ;;  %v2626_v24 = vpop.eup %2625 }
 0xc51   :  { %v909_v25 = vmul.f32 %v2626_v24, %v907_v21  ;;  %vm914_vm9 = vweird.f32 %v2626_v24  ;;  %v988_v42 = vmul.f32 %v986_v40, %v982_v4 }
 0xc52   :  { %vm915_vm11 = vmor %vm913_vm10, %vm914_vm9 }
 0xc53   :  { %v910_v7 = vsub.f32 1.0, %v909_v25 }
 0xc55   :  { %v911_v26 = vmul.f32 %v2626_v24, %v910_v7 }
 0xc57   :  { %v912_v31 = vadd.f32 %v2626_v24, %v911_v26 }
 0xc59   :  { %v916_v35 = vsel %vm915_vm11, %v2626_v24, %v912_v31 }
 0xc5a   :  { %v921_v37 = vsel %vm918_vm12, %v920_v6, %v916_v35 }
 0xc5b   :  { %v924_v46 = vmul.f32 %v921_v37, %v3071_v49 }
 0xc7b   :  { %v991_v3 = vpop.permute.xlu0 %990 }
 0xc7c   :  { %v993_v5 = vmul.f32 %v991_v3, %v982_v4 }
 0xc7e   :  { %995 = vrot.lane.b32.xlu2 %v993_v5, %s2792_s0 }
 0xcaf   :  { %v927_v36 = vpop.permute.xlu1 %926 }
 0xcb0   :  { %v929_v22 = vmul.f32 %v927_v36, %v921_v37 }
 0xcb2   :  { %931 = vrot.lane.b32.xlu0 %v929_v22, %s2792_s0 }
 0xcd8   :  { %v996_v43 = vpop.permute.xlu2 %995 }
 0xcd9   :  { %v3099_v27 = vadd.f32 %v996_v43, %v988_v42 }
 0xcdb   :  { %2627 = vtanh.f32 %v3099_v27  ;;  %v1139_v35 = vrot.slane %v3099_v27, 6 }
 0xce1   :  { %v2628_v45 = vpop.eup %2627 }
 0xce2   :  { %1001 = vrot.lane.b32.xlu1 %v2628_v45, %s2792_s0 }
 0xd24   :  { %v932_v47 = vpop.permute.xlu0 %931 }
 0xd25   :  { %v3104_v34 = vadd.f32 %v932_v47, %v924_v46 }
 0xd27   :  { %2629 = vtanh.f32 %v3104_v34 }
 0xd2d   :  { %v2630_v38 = vpop.eup %2629 }
 0xd2e   :  { %937 = vrot.lane.b32.xlu2 %v2630_v38, %s2792_s0 }
 0xd54   :  { %v1002_v44 = vpop.permute.xlu1 %1001 }
 0xd55   :  { %v1004_v51 = vmul.f32 %v1002_v44, %v982_v4 }
 0xd57   :  { %v1031_v53 = vrot.slane %v1004_v51, 2 }
 0xd59   :  { %1032 = vrot.lane.b32.xlu0 %v1031_v53, %s2793_s2 }
 0xd88   :  { %v938_v30 = vpop.permute.xlu2 %937 }
 0xd89   :  { %v3109_v39 = vmul.f32 %v938_v30, %v921_v37 }
 0xd8b   :  { %1006 = vrot.lane.b32.xlu1 %v3109_v39, %s2793_s2 }
 0xdcb   :  { %v1033_v49 = vpop.permute.xlu0 %1032 }
 0xdcc   :  { %2460 = vmatmul.msk.f32.vlgmr.msra.gmra.mxu3 %vm187_vm6, %v1033_v49  ;;  %2462 = vmatmul.msk.f32.vlgmr.msra.gmra.mxu0 %vm187_vm6, %v1033_v49 }
 0xdfd   :  { %v1007_v54 = vpop.permute.xlu1 %1006 }
 0xdfe   :  { %2459 = vmatmul.msk.f32.vlgmr.msra.gmra.mxu2 %vm187_vm6, %v1007_v54 }
 0xe49   :  { %v1111_v52 = vpop.f32.mrf.mxu0 }
 0xe4a   :  { %v1115_v55 = vrot.slane %v1111_v52, 4 }
 0xe4c   :  { %v1117_v10 = vadd.f32 %v1115_v55, %v2879_v48 }
 0xe4e   :  { %2631 = vtanh.f32 %v1117_v10  ;;  %v2463_v13 = vmul.f32 -1.442695, %v1117_v10 }
 0xe4f   :  { %v1053_v12 = vpop.f32.mrf.mxu3 }
 0xe50   :  { %2633 = vpow2.f32 %v2463_v13 }
 0xe54   :  { %v2632_v9 = vpop.eup %2631 }
 0xe55   :  { %1143 = vrot.lane.b32.xlu2 %v2632_v9, %s2792_s0 }
 0xe56   :  { %v2634_v17 = vpop.eup %2633 }
 0xe57   :  { %v1121_v56 = vadd.f32 1.0, %v2634_v17 }
 0xe59   :  { %v1133_v29 = vand.u32 2147483648, %v1121_v56  ;;  %vm1127_vm14 = vweird.f32 %v1121_v56  ;;  %v1131_v59 = vand.u32 2147483647, %v1121_v56 }
 0xe5b   :  { %v1134_v61 = vor.u32 1.1754944e-38, %v1133_v29  ;;  %vm1132_vm3 = vcmp.eq.f32.partialorder %v1131_v59, 8.507059e+37 }
 0xe81   :  { %v1027_v50 = vpop.f32.mrf.mxu2 }
 0xe82   :  { %v1054_v15 = vadd.f32 %v1053_v12, %v1027_v50 }
 0xe84   :  { %v1056_v14 = vadd.f32 %v1054_v15, %v2948_v28 }
 0xe86   :  { %2635 = vtanh.f32 %v1056_v14  ;;  %v2461_v1 = vmul.f32 -1.442695, %v1056_v14 }
 0xe87   :  { %2637 = vrcp.f32 %v1121_v56 }
 0xe88   :  { %2639 = vpow2.f32 %v2461_v1 }
 0xe8c   :  { %v2636_v18 = vpop.eup %2635 }
 0xe8d   :  { %1079 = vrot.lane.b32.xlu0 %v2636_v18, %s2792_s0  ;;  %v2638_v57 = vpop.eup %2637 }
 0xe8e   :  { %v1123_v58 = vmul.f32 %v2638_v57, %v1121_v56  ;;  %vm1128_vm13 = vweird.f32 %v2638_v57  ;;  %v2640_v2 = vpop.eup %2639 }
 0xe8f   :  { %vm1129_vm2 = vmor %vm1127_vm14, %vm1128_vm13  ;;  %v1060_v3 = vadd.f32 1.0, %v2640_v2 }
 0xe90   :  { %v1124_v11 = vsub.f32 1.0, %v1123_v58 }
 0xe91   :  { %2641 = vrcp.f32 %v1060_v3  ;;  %v1072_v24 = vand.u32 2147483648, %v1060_v3  ;;  %vm1066_vm8 = vweird.f32 %v1060_v3  ;;  %v1070_v25 = vand.u32 2147483647, %v1060_v3 }
 0xe92   :  { %v1125_v16 = vmul.f32 %v2638_v57, %v1124_v11 }
 0xe93   :  { %v1073_v26 = vor.u32 1.1754944e-38, %v1072_v24  ;;  %vm1071_vm10 = vcmp.eq.f32.partialorder %v1070_v25, 8.507059e+37 }
 0xe94   :  { %v1126_v23 = vadd.f32 %v2638_v57, %v1125_v16 }
 0xe96   :  { %v1130_v60 = vsel %vm1129_vm2, %v2638_v57, %v1126_v23 }
 0xe97   :  { %v1135_v62 = vsel %vm1132_vm3, %v1134_v61, %v1130_v60  ;;  %v2642_v4 = vpop.eup %2641 }
 0xe98   :  { %v1062_v5 = vmul.f32 %v2642_v4, %v1060_v3  ;;  %vm1067_vm7 = vweird.f32 %v2642_v4  ;;  %v1141_v6 = vmul.f32 %v1139_v35, %v1135_v62 }
 0xe99   :  { %vm1068_vm9 = vmor %vm1066_vm8, %vm1067_vm7 }
 0xe9a   :  { %v1063_v8 = vsub.f32 1.0, %v1062_v5 }
 0xe9c   :  { %v1064_v19 = vmul.f32 %v2642_v4, %v1063_v8 }
 0xe9e   :  { %v1065_v21 = vadd.f32 %v2642_v4, %v1064_v19 }
 0xea0   :  { %v1069_v7 = vsel %vm1068_vm9, %v2642_v4, %v1065_v21 }
 0xea1   :  { %v1074_v32 = vsel %vm1071_vm10, %v1073_v26, %v1069_v7 }
 0xea2   :  { %v1077_v40 = vmul.f32 %v1074_v32, %v3104_v34 }
 0xeaf   :  { %v1144_v63 = vpop.permute.xlu2 %1143 }
 0xeb0   :  { %v1146_v0 = vmul.f32 %v1144_v63, %v1135_v62 }
 0xeb2   :  { %1148 = vrot.lane.b32.xlu1 %v1146_v0, %s2792_s0 }
 0xeff   :  { %v1080_v31 = vpop.permute.xlu0 %1079 }
 0xf00   :  { %v1082_v33 = vmul.f32 %v1080_v31, %v1074_v32 }
 0xf02   :  { %1084 = vrot.lane.b32.xlu2 %v1082_v33, %s2792_s0 }
 0xf24   :  { %v1149_v36 = vpop.permute.xlu1 %1148 }
 0xf25   :  { %v3123_v37 = vadd.f32 %v1149_v36, %v1141_v6 }
 0xf27   :  { %2643 = vtanh.f32 %v3123_v37  ;;  %v1292_v7 = vrot.slane %v3123_v37, 6 }
 0xf2d   :  { %v2644_v22 = vpop.eup %2643 }
 0xf2e   :  { %1154 = vrot.lane.b32.xlu0 %v2644_v22, %s2792_s0 }
 0xf5c   :  { %v1085_v42 = vpop.permute.xlu2 %1084 }
 0xf5d   :  { %v3128_v43 = vadd.f32 %v1085_v42, %v1077_v40 }
 0xf5f   :  { %2645 = vtanh.f32 %v3128_v43 }
 0xf65   :  { %v2646_v45 = vpop.eup %2645 }
 0xf66   :  { %1090 = vrot.lane.b32.xlu1 %v2646_v45, %s2792_s0 }
 0xfa0   :  { %v1155_v27 = vpop.permute.xlu0 %1154 }
 0xfa1   :  { %v1157_v46 = vmul.f32 %v1155_v27, %v1135_v62 }
 0xfa3   :  { %v1184_v47 = vrot.slane %v1157_v46, 4 }
 0xfa5   :  { %1185 = vrot.lane.b32.xlu2 %v1184_v47, %s2793_s2 }
 0xfd8   :  { %v1091_v38 = vpop.permute.xlu1 %1090 }
 0xfd9   :  { %v3133_v44 = vmul.f32 %v1091_v38, %v1074_v32 }
 0xfdb   :  { %1159 = vrot.lane.b32.xlu0 %v3133_v44, %s2793_s2  ;;  %v1406_v37 = vrot.slane %v3133_v44, 6 }
 0xfff   :  { %v1186_v34 = vpop.permute.xlu2 %1185 }
0x1000   :  { %2465 = vmatmul.msk.f32.vlgmr.msrb.gmra.mxu2 %vm187_vm6, %v1186_v34  ;;  %2467 = vmatmul.msk.f32.vlgmr.msrb.gmra.mxu3 %vm187_vm6, %v1186_v34 }
0x104d   :  { %v1160_v51 = vpop.permute.xlu0 %1159 }
0x104e   :  { %2464 = vmatmul.msk.f32.vlgmr.msra.gmra.mxu1 %vm187_vm6, %v1160_v51 }
0x1083   :  { %v1264_v53 = vpop.f32.mrf.mxu3  ;;  %v1206_v52 = vpop.f32.mrf.mxu2 }
0x1084   :  { %v1268_v30 = vrot.slane %v1264_v53, 2 }
0x1086   :  { %v1270_v49 = vadd.f32 %v1268_v30, %v2879_v48 }
0x1088   :  { %2647 = vtanh.f32 %v1270_v49  ;;  %v2468_v13 = vmul.f32 -1.442695, %v1270_v49 }
0x108e   :  { %v2648_v54 = vpop.eup %2647 }
0x108f   :  { %1296 = vrot.lane.b32.xlu1 %v2648_v54, %s2792_s0 }
0x10cb   :  { %v1180_v55 = vpop.f32.mrf.mxu1 }
0x10cc   :  { %v1207_v10 = vadd.f32 %v1206_v52, %v1180_v55 }
0x10ce   :  { %v1209_v9 = vadd.f32 %v1207_v10, %v2948_v28  ;;  %v3164_v10 = vld [vmem:[#allocation4 + $0x88] sm:$0xff] }
0x10cf   :  { %1445 = vmatpush.msra.mxu2 %v3164_v10 }
0x10d0   :  { %2649 = vtanh.f32 %v1209_v9  ;;  %v2466_v60 = vmul.f32 -1.442695, %v1209_v9  ;;  %v3167_v9 = vld [vmem:[#allocation4 + $0x80] sm:$0xff] }
0x10d1   :  { %2651 = vpow2.f32 %v2468_v13  ;;  %v3169_v13 = vld [vmem:[#allocation4 + $0x78] sm:$0xff]  ;;  %1446 = vmatpush.msra.mxu2 %v3167_v9 }
0x10d3   :  { %1447 = vmatpush.msra.mxu2 %v3169_v13 }
0x10d6   :  { %v2650_v12 = vpop.eup %2649 }
0x10d7   :  { %1232 = vrot.lane.b32.xlu2 %v2650_v12, %s2792_s0  ;;  %v2652_v50 = vpop.eup %2651  ;;  %v2533_v12 = vpack.i.bf16 %v3167_v9, %v3164_v10 }
0x10d8   :  { %v1274_v15 = vadd.f32 1.0, %v2652_v50 }
0x10da   :  { %2653 = vrcp.f32 %v1274_v15  ;;  %v1286_v57 = vand.u32 2147483648, %v1274_v15  ;;  %vm1280_vm12 = vweird.f32 %v1274_v15  ;;  %v1284_v58 = vand.u32 2147483647, %v1274_v15 }
0x10db   :  { %2655 = vpow2.f32 %v2466_v60 }
0x10dc   :  { %v1287_v16 = vor.u32 1.1754944e-38, %v1286_v57  ;;  %vm1285_vm14 = vcmp.eq.f32.partialorder %v1284_v58, 8.507059e+37 }
0x10e0   :  { %v2654_v14 = vpop.eup %2653 }
0x10e1   :  { %v1276_v48 = vmul.f32 %v2654_v14, %v1274_v15  ;;  %vm1281_vm11 = vweird.f32 %v2654_v14  ;;  %v2656_v61 = vpop.eup %2655 }
0x10e2   :  { %vm1282_vm13 = vmor %vm1280_vm12, %vm1281_vm11  ;;  %v1213_v62 = vadd.f32 1.0, %v2656_v61 }
0x10e3   :  { %v1277_v17 = vsub.f32 1.0, %v1276_v48 }
0x10e4   :  { %2657 = vrcp.f32 %v1213_v62  ;;  %v1225_v4 = vand.u32 2147483648, %v1213_v62  ;;  %vm1219_vm3 = vweird.f32 %v1213_v62  ;;  %v1223_v5 = vand.u32 2147483647, %v1213_v62 }
0x10e5   :  { %v1278_v18 = vmul.f32 %v2654_v14, %v1277_v17 }
0x10e6   :  { %v1226_v19 = vor.u32 1.1754944e-38, %v1225_v4  ;;  %vm1224_vm8 = vcmp.eq.f32.partialorder %v1223_v5, 8.507059e+37 }
0x10e7   :  { %v1279_v56 = vadd.f32 %v2654_v14, %v1278_v18 }
0x10e9   :  { %v1283_v11 = vsel %vm1282_vm13, %v2654_v14, %v1279_v56 }
0x10ea   :  { %v1288_v29 = vsel %vm1285_vm14, %v1287_v16, %v1283_v11  ;;  %v2658_v63 = vpop.eup %2657 }
0x10eb   :  { %v1215_v0 = vmul.f32 %v2658_v63, %v1213_v62  ;;  %vm1220_vm2 = vweird.f32 %v2658_v63  ;;  %v1294_v26 = vmul.f32 %v1292_v7, %v1288_v29 }
0x10ec   :  { %vm1221_vm7 = vmor %vm1219_vm3, %vm1220_vm2 }
0x10ed   :  { %v1216_v1 = vsub.f32 1.0, %v1215_v0 }
0x10ef   :  { %v1217_v2 = vmul.f32 %v2658_v63, %v1216_v1 }
0x10f1   :  { %v1218_v3 = vadd.f32 %v2658_v63, %v1217_v2 }
0x10f3   :  { %v1222_v8 = vsel %vm1221_vm7, %v2658_v63, %v1218_v3  ;;  %v2707_v63 = vld [vmem:[#allocation6] sm:$0x7] }
0x10f4   :  { %v1227_v24 = vsel %vm1224_vm8, %v1226_v19, %v1222_v8  ;;  %v3183_v0 = vperm.slane %v2707_v63, 2 }
0x10f5   :  { %v1230_v35 = vmul.f32 %v1227_v24, %v3128_v43  ;;  %v1419_v43 = vsel %vm1413_vm4, %v3109_v39, %v1406_v37 }
0x1101   :  { %v1297_v23 = vpop.permute.xlu1 %1296 }
0x1102   :  { %v1299_v59 = vmul.f32 %v1297_v23, %v1288_v29 }
0x1104   :  { %1301 = vrot.lane.b32.xlu0 %v1299_v59, %s2792_s0 }
0x1131   :  { %v1233_v21 = vpop.permute.xlu2 %1232 }
0x1132   :  { %v1235_v25 = vmul.f32 %v1233_v21, %v1227_v24 }
0x1134   :  { %1237 = vrot.lane.b32.xlu1 %v1235_v25, %s2792_s0 }
0x1176   :  { %v1302_v31 = vpop.permute.xlu0 %1301 }
0x1177   :  { %v1304_v32 = vadd.f32 %v1302_v31, %v1294_v26 }
0x1179   :  { %2659 = vtanh.f32 %v1304_v32 }
0x117f   :  { %v2660_v33 = vpop.eup %2659 }
0x1180   :  { %1307 = vrot.lane.b32.xlu2 %v2660_v33, %s2792_s0 }
0x11a6   :  { %v1238_v6 = vpop.permute.xlu1 %1237 }
0x11a7   :  { %v1240_v36 = vadd.f32 %v1238_v6, %v1230_v35 }
0x11a9   :  { %2661 = vtanh.f32 %v1240_v36 }
0x11af   :  { %v2662_v22 = vpop.eup %2661 }
0x11b0   :  { %1243 = vrot.lane.b32.xlu0 %v2662_v22, %s2792_s0 }
0x11da   :  { %v1308_v40 = vpop.permute.xlu2 %1307 }
0x11db   :  { %v1310_v42 = vmul.f32 %v1308_v40, %v1288_v29 }
0x11dd   :  { %v1337_v45 = vrot.slane %v1310_v42, 6 }
0x11df   :  { %1338 = vrot.lane.b32.xlu2 %v1337_v45, %s2793_s2 }
0x1222   :  { %v1244_v27 = vpop.permute.xlu0 %1243 }
0x1223   :  { %v1246_v46 = vmul.f32 %v1244_v27, %v1227_v24 }
0x1225   :  { %v1408_v47 = vrot.slane %v1246_v46, 4  ;;  %1312 = vrot.lane.b32.xlu1 %v1246_v46, %s2793_s2 }
0x1227   :  { %v3156_v38 = vsel %vm1415_vm5, %v1419_v43, %v1408_v47 }
0x1239   :  { %v1339_v34 = vpop.permute.xlu2 %1338 }
0x123a   :  { %2470 = vmatmul.msk.f32.vlgmr.msrb.gmra.mxu1 %vm187_vm6, %v1339_v34 }
0x1297   :  { %v1313_v51 = vpop.permute.xlu1 %1312 }
0x1298   :  { %2469 = vmatmul.msk.f32.vlgmr.msrb.gmra.mxu0 %vm187_vm6, %v1313_v51 }
0x12b7   :  { %v1359_v53 = vpop.f32.mrf.mxu1 }
0x1315   :  { %v1333_v30 = vpop.f32.mrf.mxu0 }
0x1316   :  { %v1360_v44 = vadd.f32 %v1359_v53, %v1333_v30 }
0x1318   :  { %v1362_v49 = vadd.f32 %v1360_v44, %v2948_v28  ;;  %v3171_v28 = vld [vmem:[#allocation4 + $0x70] sm:$0xff] }
0x1319   :  { %1448 = vmatpush.msra.mxu2 %v3171_v28 }
0x131a   :  { %2663 = vtanh.f32 %v1362_v49  ;;  %v2471_v39 = vmul.f32 -1.442695, %v1362_v49 }
0x131c   :  { %2665 = vpow2.f32 %v2471_v39 }
0x1320   :  { %v2664_v54 = vpop.eup %2663 }
0x1321   :  { %1385 = vrot.lane.b32.xlu0 %v2664_v54, %s2792_s0 }
0x1322   :  { %v2666_v52 = vpop.eup %2665 }
0x1323   :  { %v1366_v55 = vadd.f32 1.0, %v2666_v52 }
0x1325   :  { %2667 = vrcp.f32 %v1366_v55  ;;  %v1378_v18 = vand.u32 2147483648, %v1366_v55  ;;  %vm1372_vm5 = vweird.f32 %v1366_v55  ;;  %v1376_v56 = vand.u32 2147483647, %v1366_v55 }
0x1327   :  { %v1379_v58 = vor.u32 1.1754944e-38, %v1378_v18  ;;  %vm1377_vm10 = vcmp.eq.f32.partialorder %v1376_v56, 8.507059e+37 }
0x1329   :  { %1425 = vrot.lane.b32.xlu0 %v3079_v41, %s2793_s2  ;;  %v2538_v41 = vpack.i.bf16 %v3171_v28, %v3169_v13 }
0x132b   :  { %v2668_v50 = vpop.eup %2667 }
0x132c   :  { %v1368_v15 = vmul.f32 %v2668_v50, %v1366_v55  ;;  %vm1373_vm4 = vweird.f32 %v2668_v50 }
0x132d   :  { %vm1374_vm9 = vmor %vm1372_vm5, %vm1373_vm4 }
0x132e   :  { %v1369_v14 = vsub.f32 1.0, %v1368_v15 }
0x1330   :  { %v1370_v48 = vmul.f32 %v2668_v50, %v1369_v14 }
0x1332   :  { %v1371_v17 = vadd.f32 %v2668_v50, %v1370_v48 }
0x1334   :  { %v1375_v57 = vsel %vm1374_vm9, %v2668_v50, %v1371_v17 }
0x1335   :  { %v1380_v16 = vsel %vm1377_vm10, %v1379_v58, %v1375_v57 }
0x1336   :  { %v1383_v59 = vmul.f32 %v1380_v16, %v1240_v36 }
0x1393   :  { %v1386_v11 = vpop.permute.xlu0 %1385 }
0x1394   :  { %v1388_v23 = vmul.f32 %v1386_v11, %v1380_v16 }
0x1396   :  { %1390 = vrot.lane.b32.xlu1 %v1388_v23, %s2792_s0 }
0x139b   :  { %v1426_v29 = vpop.permute.xlu0 %1425 }
0x139c   :  { %2472 = vmatmul.msk.f32.vlgmr.msra.gmra.mxu2 %vm187_vm6, %v1426_v29 }
0x1408   :  { %v1391_v60 = vpop.permute.xlu1 %1390 }
0x1409   :  { %v1393_v61 = vadd.f32 %v1391_v60, %v1383_v59 }
0x140b   :  { %2669 = vtanh.f32 %v1393_v61 }
0x1411   :  { %v2670_v62 = vpop.eup %2669 }
0x1412   :  { %1396 = vrot.lane.b32.xlu2 %v2670_v62, %s2792_s0 }
0x141f   :  { %v1450_v1 = vpop.f32.mrf.mxu2 }
0x1420   :  { %v1451_v2 = vadd.f32 %v1450_v1, %v3183_v0 }
0x1422   :  { %v1459_v3 = vrot.slane %v1451_v2, 4  ;;  %v2474_v4 = vrot.slane %v1451_v2, 6  ;;  %v2475_v5 = vrot.slane %v1451_v2, 10 }
0x1424   :  { %v1471_v8 = vsel %vm81_vm0, %v2474_v4, %v1451_v2  ;;  %v1479_v19 = vsel %vm81_vm0, %v2475_v5, %v1459_v3 }
0x1425   :  { %v3189_v21 = vperm.slane %v1471_v8, %v2843_v20  ;;  %v3192_v24 = vperm.slane %v1479_v19, %v2843_v20 }
0x1427   :  { %1506 = vst [vmem:[#allocation1] ss:$4 sm:$0xff] %v3189_v21  ;;  %v1476_v46 = vrot.slane %v3189_v21, 4  ;;  %v1484_v47 = vrot.slane %v3192_v24, 4 }
0x1428   :  { %1508 = vst [vmem:[#allocation1 + $0x1] ss:$4 sm:$0xff] %v3192_v24 }
0x1429   :  { %v3225_v51 = vsel %vm81_vm0, 0.0, %v1484_v47 }
0x146c   :  { %v1397_v25 = vpop.permute.xlu2 %1396 }
0x146d   :  { %v1399_v7 = vmul.f32 %v1397_v25, %v1380_v16 }
0x146f   :  { %v1411_v26 = vrot.slane %v1399_v7, 2 }
0x1471   :  { %v1421_v31 = vsel %vm1417_vm15, %v3156_v38, %v1411_v26  ;;  %v3222_v38 = vsel %vm81_vm0, 0.0, %v1476_v46 }
0x1472   :  { %1427 = vrot.lane.b32.xlu1 %v1421_v31, %s2793_s2 }
0x14e4   :  { %v1428_v32 = vpop.permute.xlu1 %1427 }
0x14e5   :  { %2473 = vmatmul.msk.f32.gmra.mxu2 %vm187_vm6, %v1428_v32 }
0x1568   :  { %v1453_v33 = vpop.f32.mrf.mxu2 }
0x1569   :  { %v1454_v35 = vadd.f32 %v1453_v33, %v3183_v0 }
0x156b   :  { %v1462_v6 = vrot.slane %v1454_v35, 4  ;;  %v2476_v36 = vrot.slane %v1454_v35, 6  ;;  %v2477_v22 = vrot.slane %v1454_v35, 10 }
0x156d   :  { %v1487_v40 = vsel %vm81_vm0, %v2476_v36, %v1454_v35  ;;  %v1495_v42 = vsel %vm81_vm0, %v2477_v22, %v1462_v6 }
0x156e   :  { %v3204_v45 = vperm.slane %v1487_v40, %v2843_v20  ;;  %v3207_v37 = vperm.slane %v1495_v42, %v2843_v20 }
0x1570   :  { %1510 = vst [vmem:[#allocation1 + $0x2] ss:$4 sm:$0xff] %v3204_v45  ;;  %v1492_v20 = vrot.slane %v3204_v45, 4  ;;  %v1500_v43 = vrot.slane %v3207_v37, 4 }
0x1571   :  { %1512 = vst [vmem:[#allocation1 + $0x3] ss:$4 sm:$0xff] %v3207_v37 }
0x1572   :  { %v3229_v53 = vsel %vm81_vm0, 0.0, %v1492_v20  ;;  %v3233_v30 = vsel %vm81_vm0, 0.0, %v1500_v43  ;;  %vm1524_vm0 = vcmask 64512  }
0x1578   :  { %v3211_v27 = vld.sshfl [vmem:[#allocation1] sm:$0xff pattern:$0x73625140] }
0x1579   :  { %1514 = vst [vmem:[#allocation1] ss:$4 sm:$0xff] %v3189_v21 }
0x157a   :  { %1516 = vst [vmem:[#allocation1 + $0x1] ss:$4 sm:$0xff] %v3192_v24 }
0x157b   :  { %1518 = vst [vmem:[#allocation1 + $0x2] ss:$4 sm:$0xff] %v3204_v45 }
0x157c   :  { %1520 = vst [vmem:[#allocation1 + $0x3] ss:$4 sm:$0xff] %v3207_v37 }
0x1583   :  { %v1521_v34 = vld.sshfl [vmem:[#allocation1] sm:$0xff pattern:$0x73625140] }
0x1584   :  { %1553 = vst [vmem:[#allocation1] ss:$4 sm:$0xff] %v3222_v38  ;;  %1522 = vrot.lane.b32.xlu2 %v1521_v34, %s2794_s28 }
0x1585   :  { %1555 = vst [vmem:[#allocation1 + $0x1] ss:$4 sm:$0xff] %v3225_v51 }
0x1586   :  { %1557 = vst [vmem:[#allocation1 + $0x2] ss:$4 sm:$0xff] %v3229_v53 }
0x1587   :  { %1559 = vst [vmem:[#allocation1 + $0x3] ss:$4 sm:$0xff] %v3233_v30 }
0x158e   :  { %v3237_v44 = vld.sshfl [vmem:[#allocation1] sm:$0xff pattern:$0x73625140] }
0x158f   :  { %1561 = vst [vmem:[#allocation1] ss:$4 sm:$0xff] %v3222_v38 }
0x1590   :  { %1563 = vst [vmem:[#allocation1 + $0x1] ss:$4 sm:$0xff] %v3225_v51 }
0x1591   :  { %1565 = vst [vmem:[#allocation1 + $0x2] ss:$4 sm:$0xff] %v3229_v53 }
0x1592   :  { %1567 = vst [vmem:[#allocation1 + $0x3] ss:$4 sm:$0xff] %v3233_v30 }
0x1599   :  { %v1568_v49 = vld.sshfl [vmem:[#allocation1] sm:$0xff pattern:$0x73625140] }
0x159a   :  { %1645 = vst [vmem:[#allocation1] ss:$4 sm:$0xff] %v3189_v21  ;;  %1569 = vrot.lane.b32.xlu2 %v1568_v49, %s2794_s28 }
0x159b   :  { %1647 = vst [vmem:[#allocation1 + $0x1] ss:$4 sm:$0xff] %v3192_v24 }
0x159c   :  { %1649 = vst [vmem:[#allocation1 + $0x2] ss:$4 sm:$0xff] %v3204_v45 }
0x159d   :  { %1651 = vst [vmem:[#allocation1 + $0x3] ss:$4 sm:$0xff] %v3207_v37 }
0x15a4   :  { %v1652_v54 = vld.sshfl [vmem:[#allocation1] sm:$0xff pattern:$0x73625140] }
0x15a5   :  { %1679 = vst [vmem:[#allocation1] ss:$4 sm:$0xff] %v3222_v38 }
0x15a6   :  { %1681 = vst [vmem:[#allocation1 + $0x1] ss:$4 sm:$0xff] %v3225_v51 }
0x15a7   :  { %1683 = vst [vmem:[#allocation1 + $0x2] ss:$4 sm:$0xff] %v3229_v53 }
0x15a8   :  { %1685 = vst [vmem:[#allocation1 + $0x3] ss:$4 sm:$0xff] %v3233_v30 }
0x15af   :  { %v3251_v39 = vld.sshfl [vmem:[#allocation1] sm:$0xff pattern:$0x73625140] }
0x15b0   :  { %1713 = vst [vmem:[#allocation1] ss:$4 sm:$0xff] %v3189_v21 }
0x15b1   :  { %1715 = vst [vmem:[#allocation1 + $0x1] ss:$4 sm:$0xff] %v3192_v24 }
0x15b2   :  { %1717 = vst [vmem:[#allocation1 + $0x2] ss:$4 sm:$0xff] %v3204_v45 }
0x15b3   :  { %1719 = vst [vmem:[#allocation1 + $0x3] ss:$4 sm:$0xff] %v3207_v37 }
0x15ba   :  { %v1720_v52 = vld.sshfl [vmem:[#allocation1] sm:$0xff pattern:$0x73625140] }
0x15bb   :  { %1723 = vst [vmem:[#allocation1] ss:$4 sm:$0xff] %v3189_v21 }
0x15bc   :  { %1725 = vst [vmem:[#allocation1 + $0x1] ss:$4 sm:$0xff] %v3192_v24 }
0x15bd   :  { %1727 = vst [vmem:[#allocation1 + $0x2] ss:$4 sm:$0xff] %v3204_v45 }
0x15be   :  { %1729 = vst [vmem:[#allocation1 + $0x3] ss:$4 sm:$0xff] %v3207_v37 }
0x15c5   :  { %v1730_v55 = vld.sshfl [vmem:[#allocation1] sm:$0xff pattern:$0x73625140] }
0x15c6   :  { %1757 = vst [vmem:[#allocation1] ss:$4 sm:$0xff] %v3222_v38  ;;  %1731 = vrot.lane.b32.xlu2 %v1730_v55, %s2795_s29 }
0x15c7   :  { %1759 = vst [vmem:[#allocation1 + $0x1] ss:$4 sm:$0xff] %v3225_v51 }
0x15c8   :  { %1761 = vst [vmem:[#allocation1 + $0x2] ss:$4 sm:$0xff] %v3229_v53 }
0x15c9   :  { %1763 = vst [vmem:[#allocation1 + $0x3] ss:$4 sm:$0xff] %v3233_v30 }
0x15ce   :  { %1653 = vrot.lane.b32.xlu2 %v1652_v54, %s2793_s2 }
0x15d0   :  { %v3266_v50 = vld.sshfl [vmem:[#allocation1] sm:$0xff pattern:$0x73625140] }
0x15d1   :  { %1767 = vst [vmem:[#allocation1] ss:$4 sm:$0xff] %v3222_v38 }
0x15d2   :  { %1769 = vst [vmem:[#allocation1 + $0x1] ss:$4 sm:$0xff] %v3225_v51 }
0x15d3   :  { %1771 = vst [vmem:[#allocation1 + $0x2] ss:$4 sm:$0xff] %v3229_v53 }
0x15d4   :  { %1773 = vst [vmem:[#allocation1 + $0x3] ss:$4 sm:$0xff] %v3233_v30 }
0x15d6   :  { %1721 = vrot.lane.b32.xlu2 %v1720_v52, %s2796_s30 }
0x15db   :  { %v1774_v15 = vld.sshfl [vmem:[#allocation1] sm:$0xff pattern:$0x73625140] }
0x15dc   :  { %1851 = vst [vmem:[#allocation1] ss:$4 sm:$0xff] %v3189_v21 }
0x15dd   :  { %1853 = vst [vmem:[#allocation1 + $0x1] ss:$4 sm:$0xff] %v3192_v24 }
0x15de   :  { %1855 = vst [vmem:[#allocation1 + $0x2] ss:$4 sm:$0xff] %v3204_v45  ;;  %1775 = vrot.lane.b32.xlu2 %v1774_v15, %s2795_s29  ;;  %v1523_v17 = vpop.permute.xlu2 %1522 }
0x15df   :  { %1857 = vst [vmem:[#allocation1 + $0x3] ss:$4 sm:$0xff] %v3207_v37  ;;  %2478 = vmatpush.xpose.msk.msra.mxu3 %vm1524_vm0, %v1523_v17 }
0x15e2   :  { %2479 = vmatmul.msk.f32.vlgmr.msra.gmra.mxu3 %vm1524_vm0, %v3211_v27 }
0x15e6   :  { %v3277_v14 = vld.sshfl [vmem:[#allocation1] sm:$0xff pattern:$0x73625140] }
0x15e7   :  { %1885 = vst [vmem:[#allocation1] ss:$4 sm:$0xff] %v3222_v38 }
0x15e8   :  { %1887 = vst [vmem:[#allocation1 + $0x1] ss:$4 sm:$0xff] %v3225_v51 }
0x15e9   :  { %1889 = vst [vmem:[#allocation1 + $0x2] ss:$4 sm:$0xff] %v3229_v53 }
0x15ea   :  { %1891 = vst [vmem:[#allocation1 + $0x3] ss:$4 sm:$0xff] %v3233_v30 }
0x15f1   :  { %v3283_v48 = vld.sshfl [vmem:[#allocation1] sm:$0xff pattern:$0x73625140] }
0x15f2   :  { %1919 = vst [vmem:[#allocation1] ss:$4 sm:$0xff] %v3189_v21 }
0x15f3   :  { %1921 = vst [vmem:[#allocation1 + $0x1] ss:$4 sm:$0xff] %v3192_v24 }
0x15f4   :  { %1923 = vst [vmem:[#allocation1 + $0x2] ss:$4 sm:$0xff] %v3204_v45  ;;  %v1570_v56 = vpop.permute.xlu2 %1569 }
0x15f5   :  { %1925 = vst [vmem:[#allocation1 + $0x3] ss:$4 sm:$0xff] %v3207_v37  ;;  %2480 = vmatpush.xpose.msk.msra.mxu0 %vm1524_vm0, %v1570_v56 }
0x15f8   :  { %2481 = vmatmul.msk.f32.vlgmr.msra.gmra.mxu0 %vm1524_vm0, %v3237_v44 }
0x15fc   :  { %v1926_v18 = vld.sshfl [vmem:[#allocation1] sm:$0xff pattern:$0x73625140] }
0x15fd   :  { %1929 = vst [vmem:[#allocation1] ss:$4 sm:$0xff] %v3189_v21  ;;  %1927 = vrot.lane.b32.xlu1 %v1926_v18, %s2797_s4 }
0x15fe   :  { %1931 = vst [vmem:[#allocation1 + $0x1] ss:$4 sm:$0xff] %v3192_v24 }
0x15ff   :  { %1933 = vst [vmem:[#allocation1 + $0x2] ss:$4 sm:$0xff] %v3204_v45 }
0x1600   :  { %1935 = vst [vmem:[#allocation1 + $0x3] ss:$4 sm:$0xff] %v3207_v37 }
0x1607   :  { %v1936_v57 = vld.sshfl [vmem:[#allocation1] sm:$0xff pattern:$0x73625140] }
0x1608   :  { %1963 = vst [vmem:[#allocation1] ss:$4 sm:$0xff] %v3222_v38  ;;  %1937 = vrot.lane.b32.xlu2 %v1936_v57, %s2798_s5 }
0x1609   :  { %1965 = vst [vmem:[#allocation1 + $0x1] ss:$4 sm:$0xff] %v3225_v51 }
0x160a   :  { %1967 = vst [vmem:[#allocation1 + $0x2] ss:$4 sm:$0xff] %v3229_v53 }
0x160b   :  { %1969 = vst [vmem:[#allocation1 + $0x3] ss:$4 sm:$0xff] %v3233_v30 }
0x1612   :  { %v3304_v58 = vld.sshfl [vmem:[#allocation1] sm:$0xff pattern:$0x73625140] }
0x1613   :  { %1973 = vst [vmem:[#allocation1] ss:$4 sm:$0xff] %v3222_v38 }
0x1614   :  { %1975 = vst [vmem:[#allocation1 + $0x1] ss:$4 sm:$0xff] %v3225_v51 }
0x1615   :  { %1977 = vst [vmem:[#allocation1 + $0x2] ss:$4 sm:$0xff] %v3229_v53 }
0x1616   :  { %1979 = vst [vmem:[#allocation1 + $0x3] ss:$4 sm:$0xff] %v3233_v30 }
0x161d   :  { %v1980_v11 = vld.sshfl [vmem:[#allocation1] sm:$0xff pattern:$0x73625140] }
0x161e   :  { %2057 = vst [vmem:[#allocation1] ss:$4 sm:$0xff] %v3189_v21  ;;  %1981 = vrot.lane.b32.xlu2 %v1980_v11, %s2798_s5 }
0x161f   :  { %2059 = vst [vmem:[#allocation1 + $0x1] ss:$4 sm:$0xff] %v3192_v24 }
0x1620   :  { %2061 = vst [vmem:[#allocation1 + $0x2] ss:$4 sm:$0xff] %v3204_v45  ;;  %v1732_v16 = vpop.permute.xlu2 %1731 }
0x1621   :  { %2063 = vst [vmem:[#allocation1 + $0x3] ss:$4 sm:$0xff] %v3207_v37  ;;  %2484 = vmatpush.xpose.msk.msrb.mxu0 %vm1524_vm0, %v1732_v16 }
0x1628   :  { %v3315_v23 = vld.sshfl [vmem:[#allocation1] sm:$0xff pattern:$0x73625140]  ;;  %v1654_v29 = vpop.permute.xlu2 %1653 }
0x1629   :  { %2091 = vst [vmem:[#allocation1] ss:$4 sm:$0xff] %v3222_v38  ;;  %1674 = vmatpush.msra.mxu1 %v1654_v29 }
0x162a   :  { %2093 = vst [vmem:[#allocation1 + $0x1] ss:$4 sm:$0xff] %v3225_v51 }
0x162b   :  { %2095 = vst [vmem:[#allocation1 + $0x2] ss:$4 sm:$0xff] %v3229_v53 }
0x162c   :  { %2097 = vst [vmem:[#allocation1 + $0x3] ss:$4 sm:$0xff] %v3233_v30 }
0x1630   :  { %v1722_v60 = vpop.permute.xlu2 %1721 }
0x1631   :  { %2485 = vmatmul.msk.f32.vlgmr.msrb.gmra.mxu0 %vm1524_vm0, %v1722_v60 }
0x1633   :  { %v3321_v59 = vld.sshfl [vmem:[#allocation1] sm:$0xff pattern:$0x73625140] }
0x1634   :  { %2125 = vst [vmem:[#allocation1] ss:$4 sm:$0xff] %v3189_v21 }
0x1635   :  { %2127 = vst [vmem:[#allocation1 + $0x1] ss:$4 sm:$0xff] %v3192_v24 }
0x1636   :  { %2129 = vst [vmem:[#allocation1 + $0x2] ss:$4 sm:$0xff] %v3204_v45 }
0x1637   :  { %2131 = vst [vmem:[#allocation1 + $0x3] ss:$4 sm:$0xff] %v3207_v37 }
0x1638   :  { %v1776_v61 = vpop.permute.xlu2 %1775 }
0x1639   :  { %2486 = vmatpush.xpose.msk.msrb.mxu1 %vm1524_vm0, %v1776_v61 }
0x163e   :  { %v2132_v62 = vld.sshfl [vmem:[#allocation1] sm:$0xff pattern:$0x73625140] }
0x163f   :  { %2135 = vst [vmem:[#allocation1] ss:$4 sm:$0xff] %v3189_v21 }
0x1640   :  { %2137 = vst [vmem:[#allocation1 + $0x1] ss:$4 sm:$0xff] %v3192_v24 }
0x1641   :  { %2139 = vst [vmem:[#allocation1 + $0x2] ss:$4 sm:$0xff] %v3204_v45 }
0x1642   :  { %2141 = vst [vmem:[#allocation1 + $0x3] ss:$4 sm:$0xff] %v3207_v37 }
0x1649   :  { %v2142_v63 = vld.sshfl [vmem:[#allocation1] sm:$0xff pattern:$0x73625140] }
0x164a   :  { %2143 = vrot.lane.b32.xlu2 %v2142_v63, %s2799_s6  ;;  %2169 = vst [vmem:[#allocation1] ss:$4 sm:$0xff] %v3222_v38 }
0x164b   :  { %2171 = vst [vmem:[#allocation1 + $0x1] ss:$4 sm:$0xff] %v3225_v51 }
0x164c   :  { %2173 = vst [vmem:[#allocation1 + $0x2] ss:$4 sm:$0xff] %v3229_v53 }
0x164d   :  { %2175 = vst [vmem:[#allocation1 + $0x3] ss:$4 sm:$0xff] %v3233_v30 }
0x1652   :  { %2133 = vrot.lane.b32.xlu2 %v2132_v62, %s2800_s7 }
0x1654   :  { %v2176_v1 = vld.sshfl [vmem:[#allocation1] sm:$0xff pattern:$0x73625140] }
0x1655   :  { %2179 = vst [vmem:[#allocation1] ss:$4 sm:$0xff] %v3222_v38 }
0x1656   :  { %2181 = vst [vmem:[#allocation1 + $0x1] ss:$4 sm:$0xff] %v3225_v51 }
0x1657   :  { %2183 = vst [vmem:[#allocation1 + $0x2] ss:$4 sm:$0xff] %v3229_v53 }
0x1658   :  { %2185 = vst [vmem:[#allocation1 + $0x3] ss:$4 sm:$0xff] %v3233_v30 }
0x165f   :  { %v2186_v2 = vld.sshfl [vmem:[#allocation1] sm:$0xff pattern:$0x73625140] }
0x1660   :  { %2263 = vst [vmem:[#allocation1] ss:$4 sm:$0xff] %v3189_v21 }
0x1661   :  { %2265 = vst [vmem:[#allocation1 + $0x1] ss:$4 sm:$0xff] %v3192_v24 }
0x1662   :  { %v1938_v3 = vpop.permute.xlu2 %1937  ;;  %2267 = vst [vmem:[#allocation1 + $0x2] ss:$4 sm:$0xff] %v3204_v45 }
0x1663   :  { %2490 = vmatpush.xpose.msk.msra.mxu0 %vm1524_vm0, %v1938_v3  ;;  %2269 = vst [vmem:[#allocation1 + $0x3] ss:$4 sm:$0xff] %v3207_v37 }
0x1665   :  { %v1546_v8 = vpop.f32.mrf.mxu3 }
0x1666   :  { %v1595_v19 = vsel %vm1524_vm0, %v1546_v8, -inf }
0x1667   :  { %1596 = vmax.xlane.f32.xlu0 %v1595_v19 }
0x166a   :  { %v3347_v4 = vld.sshfl [vmem:[#allocation1] sm:$0xff pattern:$0x73625140] }
0x166b   :  { %2297 = vst [vmem:[#allocation1] ss:$4 sm:$0xff] %v3222_v38 }
0x166c   :  { %2299 = vst [vmem:[#allocation1 + $0x1] ss:$4 sm:$0xff] %v3225_v51 }
0x166d   :  { %2301 = vst [vmem:[#allocation1 + $0x2] ss:$4 sm:$0xff] %v3229_v53 }
0x166e   :  { %2303 = vst [vmem:[#allocation1 + $0x3] ss:$4 sm:$0xff] %v3233_v30 }
0x166f   :  { %v1928_v5 = vpop.permute.xlu1 %1927 }
0x1670   :  { %2491 = vmatmul.msk.f32.vlgmr.msra.gmra.mxu0 %vm1524_vm0, %v1928_v5 }
0x1675   :  { %v3355_v21 = vpop.f32.mrf.mxu0 }
0x1676   :  { %v1598_v24 = vsel %vm1524_vm0, %v3355_v21, -inf }
0x1678   :  { %v1982_v25 = vpop.permute.xlu2 %1981 }
0x167b   :  { %1599 = vmax.xlane.f32.xlu2 %v1598_v24  ;;  %1765 = vrot.lane.b32.xlu0 %v3266_v50, %s2796_s30 }
0x1683   :  { %1971 = vrot.lane.b32.xlu0 %v3304_v58, %s2797_s4 }
0x168b   :  { %2177 = vrot.lane.b32.xlu0 %v2176_v1, %s2800_s7 }
0x16a4   :  { %v2144_v7 = vpop.permute.xlu2 %2143 }
0x16a5   :  { %2496 = vmatpush.xpose.msk.msrb.mxu0 %vm1524_vm0, %v2144_v7 }
0x16ac   :  { %v2134_v26 = vpop.permute.xlu2 %2133 }
0x16ad   :  { %2497 = vmatmul.msk.f32.vlgmr.msrb.gmra.mxu0 %vm1524_vm0, %v2134_v26 }
0x16ae   :  { %v1754_v31 = vpop.f32.mrf.mxu0 }
0x16af   :  { %v1801_v37 = vsel %vm1524_vm0, %v1754_v31, -inf }
0x16da   :  { %v1597_v33 = vpop.xlane.xlu0 %1596 }
0x16db   :  { %v1601_v6 = vsub.f32 %v1546_v8, %v1597_v33 }
0x16dd   :  { %v1603_v36 = vmul.f32 1.442695, %v1601_v6 }
0x16df   :  { %2671 = vpow2.f32 %v1603_v36 }
0x16e5   :  { %v2672_v22 = vpop.eup %2671 }
0x16e6   :  { %v1607_v40 = vsel %vm1524_vm0, %v2672_v22, 0.0 }
0x16e7   :  { %1608 = vadd.xlane.f32.xlu1 %v1607_v40 }
0x16ed   :  { %v3365_v32 = vpop.f32.mrf.mxu0  ;;  %v1766_v49 = vpop.permute.xlu0 %1765 }
0x16ee   :  { %v2007_v35 = vsel %vm1524_vm0, %v3365_v32, -inf  ;;  %v1600_v60 = vpop.xlane.xlu2 %1599 }
0x16ef   :  { %2008 = vmax.xlane.f32.xlu2 %v2007_v35  ;;  %v1602_v61 = vsub.f32 %v3355_v21, %v1600_v60  ;;  %v2528_v35 = vpack.i.bf16 %v3283_v48, %v3277_v14 }
0x16f1   :  { %v1605_v1 = vmul.f32 1.442695, %v1602_v61 }
0x16f5   :  { %v1972_v52 = vpop.permute.xlu0 %1971 }
0x16fd   :  { %v2178_v50 = vpop.permute.xlu0 %2177 }
0x1700   :  { %2187 = vrot.lane.b32.xlu1 %v2186_v2, %s2799_s6 }
0x172a   :  { %v2166_v42 = vpop.f32.mrf.mxu0  ;;  %1802 = vmax.xlane.f32.xlu1 %v1801_v37 }
0x172b   :  { %v2213_v45 = vsel %vm1524_vm0, %v2166_v42, -inf }
0x172c   :  { %2214 = vmax.xlane.f32.xlu0 %v2213_v45 }
0x175a   :  { %v1609_v27 = vpop.xlane.xlu1 %1608 }
0x175b   :  { %2673 = vrcp.f32 %v1609_v27  ;;  %v1624_v34 = vand.u32 2147483648, %v1609_v27  ;;  %vm1618_vm11 = vweird.f32 %v1609_v27  ;;  %v1622_v51 = vand.u32 2147483647, %v1609_v27 }
0x175d   :  { %v1625_v30 = vor.u32 1.1754944e-38, %v1624_v34  ;;  %vm1623_vm13 = vcmp.eq.f32.partialorder %v1622_v51, 8.507059e+37 }
0x1761   :  { %v2674_v46 = vpop.eup %2673 }
0x1762   :  { %v1614_v47 = vmul.f32 %v2674_v46, %v1609_v27  ;;  %vm1619_vm15 = vweird.f32 %v2674_v46  ;;  %v2009_v2 = vpop.xlane.xlu2 %2008 }
0x1763   :  { %vm1620_vm12 = vmor %vm1618_vm11, %vm1619_vm15  ;;  %v2013_v5 = vsub.f32 %v3365_v32, %v2009_v2 }
0x1764   :  { %v1615_v20 = vsub.f32 1.0, %v1614_v47 }
0x1765   :  { %v2015_v21 = vmul.f32 1.442695, %v2013_v5 }
0x1766   :  { %v1616_v43 = vmul.f32 %v2674_v46, %v1615_v20 }
0x1768   :  { %v1617_v38 = vadd.f32 %v2674_v46, %v1616_v43 }
0x176a   :  { %v1621_v53 = vsel %vm1620_vm12, %v2674_v46, %v1617_v38 }
0x176b   :  { %v1626_v44 = vsel %vm1623_vm13, %v1625_v30, %v1621_v53 }
0x176c   :  { %v3373_v54 = vmul.f32 %v2672_v22, %v1626_v44 }
0x176e   :  { %2482 = vmatmul.msk.f32.vlgmr.msra.gmra.mxu1 %vm1524_vm0, %v3373_v54 }
0x176f   :  { %2492 = vmatpush.xpose.msk.msra.mxu1 %vm1524_vm0, %v1982_v25 }
0x1772   :  { %v2188_v55 = vpop.permute.xlu1 %2187 }
0x1776   :  { %2487 = vmatmul.msk.f32.vlgmr.msrb.gmra.mxu1 %vm1524_vm0, %v1766_v49 }
0x1777   :  { %2498 = vmatpush.xpose.msk.msrb.mxu1 %vm1524_vm0, %v2188_v55 }
0x177e   :  { %2493 = vmatmul.msk.f32.vlgmr.msra.gmra.mxu1 %vm1524_vm0, %v1972_v52 }
0x1786   :  { %2499 = vmatmul.msk.f32.vlgmr.msrb.gmra.mxu1 %vm1524_vm0, %v2178_v50 }
0x179d   :  { %v1803_v58 = vpop.xlane.xlu1 %1802 }
0x179e   :  { %v1807_v11 = vsub.f32 %v1754_v31, %v1803_v58 }
0x179f   :  { %v2215_v15 = vpop.xlane.xlu0 %2214 }
0x17a0   :  { %v2219_v17 = vsub.f32 %v2166_v42, %v2215_v15  ;;  %v1809_v29 = vmul.f32 1.442695, %v1807_v11 }
0x17a2   :  { %v2221_v18 = vmul.f32 1.442695, %v2219_v17 }
0x17a4   :  { %2675 = vpow2.f32 %v2221_v18 }
0x17a5   :  { %2677 = vpow2.f32 %v1809_v29 }
0x17a6   :  { %2679 = vpow2.f32 %v1605_v1 }
0x17a7   :  { %2681 = vpow2.f32 %v2015_v21 }
0x17aa   :  { %v3382_v56 = vpop.eup %2675 }
0x17ab   :  { %v2225_v57 = vsel %vm1524_vm0, %v3382_v56, 0.0  ;;  %v3390_v3 = vpop.eup %2677 }
0x17ac   :  { %2226 = vadd.xlane.f32.xlu2 %v2225_v57  ;;  %v1813_v24 = vsel %vm1524_vm0, %v3390_v3, 0.0  ;;  %v3396_v25 = vpop.eup %2679 }
0x17ad   :  { %v1610_v26 = vsel %vm1524_vm0, %v3396_v25, 0.0  ;;  %v3401_v32 = vpop.eup %2681 }
0x17ae   :  { %v2019_v33 = vsel %vm1524_vm0, %v3401_v32, 0.0 }
0x17eb   :  { %v3386_v16 = vpop.f32.mrf.mxu1 }
0x17f3   :  { %v1798_v62 = vpop.f32.mrf.mxu1 }
0x17f4   :  { %v1804_v63 = vsel %vm1524_vm0, %v1798_v62, -inf }
0x17f5   :  { %1805 = vmax.xlane.f32.xlu0 %v1804_v63 }
0x17fb   :  { %v2004_v8 = vpop.f32.mrf.mxu1 }
0x17fc   :  { %v2010_v19 = vsel %vm1524_vm0, %v2004_v8, -inf }
0x17fd   :  { %2011 = vmax.xlane.f32.xlu1 %v2010_v19  ;;  %1814 = vadd.xlane.f32.xlu0 %v1813_v24  ;;  %v2304_v19 = vld.sshfl [vmem:[#allocation1] sm:$0xff pattern:$0x73625140] }
0x1803   :  { %v2210_v7 = vpop.f32.mrf.mxu1 }
0x1804   :  { %v2216_v31 = vsel %vm1524_vm0, %v2210_v7, -inf }
0x1805   :  { %1611 = vadd.xlane.f32.xlu1 %v1610_v26  ;;  %2217 = vmax.xlane.f32.xlu2 %v2216_v31 }
0x180d   :  { %2020 = vadd.xlane.f32.xlu1 %v2019_v33 }
0x1811   :  { %2529 = vrot.lane.b32.xlu0 %v2528_v35, %s2801_s8 }
0x181f   :  { %v3415_v40 = vpop.xlane.xlu2 %2226 }
0x1826   :  { %1687 = vrot.lane.b32.xlu1 %v3251_v39, %s2793_s2 }
0x182e   :  { %2271 = vrot.lane.b32.xlu1 %v3347_v4, %s2802_s9 }
0x1836   :  { %2534 = vrot.lane.b32.xlu1 %v2533_v12, %s2792_s0 }
0x1868   :  { %v1806_v6 = vpop.xlane.xlu0 %1805 }
0x1869   :  { %v1808_v36 = vsub.f32 %v1798_v62, %v1806_v6 }
0x186b   :  { %v1811_v22 = vmul.f32 1.442695, %v1808_v36 }
0x186d   :  { %2683 = vpow2.f32 %v1811_v22 }
0x1870   :  { %v1815_v14 = vpop.xlane.xlu0 %1814  ;;  %v2012_v48 = vpop.xlane.xlu1 %2011 }
0x1871   :  { %2685 = vrcp.f32 %v1815_v14  ;;  %v2014_v42 = vsub.f32 %v2004_v8, %v2012_v48  ;;  %v1830_v38 = vand.u32 2147483648, %v1815_v14  ;;  %v1828_v34 = vand.u32 2147483647, %v1815_v14 }
0x1872   :  { %vm1824_vm2 = vweird.f32 %v1815_v14 }
0x1873   :  { %v3417_v39 = vpop.eup %2683  ;;  %v2017_v45 = vmul.f32 1.442695, %v2014_v42  ;;  %v1831_v49 = vor.u32 1.1754944e-38, %v1830_v38  ;;  %vm1829_vm7 = vcmp.eq.f32.partialorder %v1828_v34, 8.507059e+37 }
0x1874   :  { %v1816_v4 = vsel %vm1524_vm0, %v3417_v39, 0.0 }
0x1875   :  { %1817 = vadd.xlane.f32.xlu2 %v1816_v4  ;;  %2687 = vpow2.f32 %v2017_v45 }
0x1877   :  { %v2686_v10 = vpop.eup %2685 }
0x1878   :  { %v1820_v9 = vmul.f32 %v2686_v10, %v1815_v14  ;;  %v2218_v12 = vpop.xlane.xlu2 %2217  ;;  %v1612_v37 = vpop.xlane.xlu1 %1611  ;;  %vm1825_vm14 = vweird.f32 %v2686_v10 }
0x1879   :  { %v2220_v27 = vsub.f32 %v2210_v7, %v2218_v12  ;;  %2689 = vrcp.f32 %v1612_v37  ;;  %vm1826_vm3 = vmor %vm1824_vm2, %vm1825_vm14  ;;  %v1639_v60 = vand.u32 2147483648, %v1612_v37  ;;  %vm1633_vm4 = vweird.f32 %v1612_v37 }
0x187a   :  { %v1821_v46 = vsub.f32 1.0, %v1820_v9  ;;  %v1637_v61 = vand.u32 2147483647, %v1612_v37 }
0x187b   :  { %v2223_v47 = vmul.f32 1.442695, %v2220_v27  ;;  %v3421_v20 = vpop.eup %2687  ;;  %v1640_v1 = vor.u32 1.1754944e-38, %v1639_v60 }
0x187c   :  { %v1822_v43 = vmul.f32 %v2686_v10, %v1821_v46  ;;  %v2022_v51 = vsel %vm1524_vm0, %v3421_v20, 0.0  ;;  %vm1638_vm9 = vcmp.eq.f32.partialorder %v1637_v61, 8.507059e+37 }
0x187d   :  { %2691 = vpow2.f32 %v2223_v47  ;;  %2023 = vadd.xlane.f32.xlu0 %v2022_v51 }
0x187e   :  { %v1823_v53 = vadd.f32 %v2686_v10, %v1822_v43 }
0x187f   :  { %v2690_v30 = vpop.eup %2689 }
0x1880   :  { %v1827_v44 = vsel %vm1826_vm3, %v2686_v10, %v1823_v53  ;;  %v1629_v55 = vmul.f32 %v2690_v30, %v1612_v37  ;;  %vm1634_vm8 = vweird.f32 %v2690_v30  ;;  %v2021_v62 = vpop.xlane.xlu1 %2020 }
0x1881   :  { %v1832_v52 = vsel %vm1829_vm7, %v1831_v49, %v1827_v44  ;;  %vm1635_vm5 = vmor %vm1633_vm4, %vm1634_vm8  ;;  %2693 = vrcp.f32 %v2021_v62  ;;  %v2036_v45 = vand.u32 2147483648, %v2021_v62  ;;  %vm2030_vm14 = vweird.f32 %v2021_v62 }
0x1882   :  { %v3430_v57 = vmul.f32 %v3390_v3, %v1832_v52  ;;  %v1630_v58 = vsub.f32 1.0, %v1629_v55  ;;  %v2034_v10 = vand.u32 2147483647, %v2021_v62  ;;  %v2242_v55 = vand.u32 2147483648, %v3415_v40 }
0x1883   :  { %v3425_v50 = vpop.eup %2691  ;;  %v2530_v15 = vpop.permute.xlu0 %2529  ;;  %v2037_v38 = vor.u32 1.1754944e-38, %v2036_v45 }
0x1884   :  { %v2531_v17 = vunpack.i.l.bf16 %v2530_v15  ;;  %v2228_v18 = vsel %vm1524_vm0, %v3425_v50, 0.0  ;;  %v1631_v11 = vmul.f32 %v2690_v30, %v1630_v58  ;;  %v2532_v8 = vunpack.i.h.bf16 %v2530_v15 }
0x1885   :  { %2229 = vadd.xlane.f32.xlu2 %v2228_v18  ;;  %vm2035_vm3 = vcmp.eq.f32.partialorder %v2034_v10, 8.507059e+37 }
0x1886   :  { %1880 = vmatpush.msrb.mxu2 %v2531_v17  ;;  %v1632_v29 = vadd.f32 %v2690_v30, %v1631_v11 }
0x1887   :  { %2488 = vmatmul.msk.f32.vlgmr.msrb.gmra.mxu2 %vm1524_vm0, %v3430_v57 }
0x1888   :  { %v1636_v63 = vsel %vm1635_vm5, %v2690_v30, %v1632_v29  ;;  %vm2236_vm5 = vweird.f32 %v3415_v40 }
0x1889   :  { %v1641_v2 = vsel %vm1638_vm9, %v1640_v1, %v1636_v63  ;;  %v2243_v1 = vor.u32 1.1754944e-38, %v2242_v55 }
0x188a   :  { %v3436_v5 = vmul.f32 %v3396_v25, %v1641_v2 }
0x1891   :  { %2099 = vrot.lane.b32.xlu0 %v3321_v59, %s2803_s10  ;;  %v2694_v59 = vpop.eup %2693 }
0x1892   :  { %v2026_v21 = vmul.f32 %v2694_v59, %v2021_v62  ;;  %vm2031_vm11 = vweird.f32 %v2694_v59 }
0x1893   :  { %vm2032_vm2 = vmor %vm2030_vm14, %vm2031_vm11 }
0x1894   :  { %v2027_v7 = vsub.f32 1.0, %v2026_v21 }
0x1896   :  { %v2028_v13 = vmul.f32 %v2694_v59, %v2027_v7 }
0x1898   :  { %v1688_v3 = vpop.permute.xlu1 %1687  ;;  %v2029_v14 = vadd.f32 %v2694_v59, %v2028_v13 }
0x1899   :  { %1708 = vmatpush.msrb.mxu3 %v1688_v3  ;;  %2305 = vrot.lane.b32.xlu0 %v2304_v19, %s2802_s9 }
0x189a   :  { %2483 = vmatmul.msk.f32.vlgmr.msrb.gmra.mxu3 %vm1524_vm0, %v3436_v5  ;;  %v2033_v46 = vsel %vm2032_vm2, %v2694_v59, %v2029_v14 }
0x189b   :  { %1914 = vmatpush.msra.mxu3 %v2532_v8  ;;  %v2038_v30 = vsel %vm2035_vm3, %v2037_v38, %v2033_v46  ;;  %vm2359_vm3 = vcmask 195584  }
0x189c   :  { %v2039_v11 = vmul.f32 %v3401_v32, %v2038_v30 }
0x189d   :  { %2065 = vrot.lane.b32.xlu2 %v3315_v23, %s2803_s10 }
0x18a0   :  { %v2272_v62 = vpop.permute.xlu1 %2271 }
0x18a1   :  { %2539 = vrot.lane.b32.xlu0 %v2538_v41, %s2792_s0 }
0x18e8   :  { %v1818_v24 = vpop.xlane.xlu2 %1817 }
0x18e9   :  { %2695 = vrcp.f32 %v1818_v24  ;;  %v1845_v28 = vand.u32 2147483648, %v1818_v24  ;;  %v1843_v6 = vand.u32 2147483647, %v1818_v24  ;;  %vm1839_vm15 = vweird.f32 %v1818_v24 }
0x18ea   :  { %2697 = vrcp.f32 %v3415_v40 }
0x18eb   :  { %v1846_v48 = vor.u32 1.1754944e-38, %v1845_v28  ;;  %vm1844_vm13 = vcmp.eq.f32.partialorder %v1843_v6, 8.507059e+37 }
0x18ef   :  { %v2696_v25 = vpop.eup %2695 }
0x18f0   :  { %v3447_v26 = vpop.eup %2697  ;;  %v1835_v31 = vmul.f32 %v2696_v25, %v1818_v24  ;;  %v2024_v33 = vpop.xlane.xlu0 %2023  ;;  %vm1840_vm10 = vweird.f32 %v2696_v25 }
0x18f1   :  { %2699 = vrcp.f32 %v2024_v33  ;;  %v2232_v23 = vmul.f32 %v3447_v26, %v3415_v40  ;;  %vm1841_vm12 = vmor %vm1839_vm15, %vm1840_vm10  ;;  %v2051_v34 = vand.u32 2147483648, %v2024_v33  ;;  %v2049_v53 = vand.u32 2147483647, %v2024_v33 }
0x18f2   :  { %v1836_v35 = vsub.f32 1.0, %v1835_v31  ;;  %vm2237_vm8 = vweird.f32 %v3447_v26  ;;  %vm2045_vm4 = vweird.f32 %v2024_v33 }
0x18f3   :  { %v2233_v22 = vsub.f32 1.0, %v2232_v23  ;;  %v2052_v15 = vor.u32 1.1754944e-38, %v2051_v34  ;;  %vm2050_vm10 = vcmp.eq.f32.partialorder %v2049_v53, 8.507059e+37  ;;  %vm3460_vm15 = vmor %vm2236_vm5, %vm2237_vm8 }
0x18f4   :  { %v1837_v41 = vmul.f32 %v2696_v25, %v1836_v35 }
0x18f5   :  { %v2234_v27 = vmul.f32 %v3447_v26, %v2233_v22 }
0x18f6   :  { %v1838_v36 = vadd.f32 %v2696_v25, %v1837_v41 }
0x18f7   :  { %v2700_v42 = vpop.eup %2699  ;;  %v2235_v44 = vadd.f32 %v3447_v26, %v2234_v27 }
0x18f8   :  { %v1842_v4 = vsel %vm1841_vm12, %v2696_v25, %v1838_v36  ;;  %v2041_v12 = vmul.f32 %v2700_v42, %v2024_v33  ;;  %v2230_v37 = vpop.xlane.xlu2 %2229  ;;  %vm2046_vm7 = vweird.f32 %v2700_v42 }
0x18f9   :  { %v1847_v9 = vsel %vm1844_vm13, %v1846_v48, %v1842_v4  ;;  %2701 = vrcp.f32 %v2230_v37  ;;  %vm2047_vm9 = vmor %vm2045_vm4, %vm2046_vm7  ;;  %v2239_v61 = vsel %vm3460_vm15, %v3447_v26, %v2235_v44  ;;  %v2257_v2 = vand.u32 2147483648, %v2230_v37 }
0x18fa   :  { %v2042_v47 = vsub.f32 1.0, %v2041_v12  ;;  %v1848_v43 = vmul.f32 %v3417_v39, %v1847_v9  ;;  %v2240_v39 = vand.u32 2147483647, %v3415_v40  ;;  %v2255_v8 = vand.u32 2147483647, %v2230_v37 }
0x18fb   :  { %vm2251_vm13 = vweird.f32 %v2230_v37  ;;  %v2258_v25 = vor.u32 1.1754944e-38, %v2257_v2  ;;  %vm2423_vm7 = vcmask 326656  }
0x18fc   :  { %v2043_v51 = vmul.f32 %v2700_v42, %v2042_v47  ;;  %2489 = vmatmul.msk.f32.vlgmr.msra.gmra.mxu3 %vm1524_vm0, %v1848_v43  ;;  %vm2241_vm11 = vcmp.eq.f32.partialorder %v2240_v39, 8.507059e+37  ;;  %v1850_v19 = vadd.f32 %v1848_v43, %v3436_v5  ;;  %vm2256_vm2 = vcmp.eq.f32.partialorder %v2255_v8, 8.507059e+37 }
0x18fd   :  { %v2244_v59 = vsel %vm2241_vm11, %v2243_v1, %v2239_v61 }
0x18fe   :  { %v2044_v49 = vadd.f32 %v2700_v42, %v2043_v51  ;;  %v2245_v7 = vmul.f32 %v3382_v56, %v2244_v59  ;;  %v1849_v56 = vadd.f32 %v3430_v57, %v3373_v54 }
0x18ff   :  { %v2702_v52 = vpop.eup %2701 }
0x1900   :  { %v2048_v17 = vsel %vm2047_vm9, %v2700_v42, %v2044_v49  ;;  %v2247_v18 = vmul.f32 %v2702_v52, %v2230_v37  ;;  %v2066_v58 = vpop.permute.xlu2 %2065  ;;  %vm2252_vm12 = vweird.f32 %v2702_v52  ;;  %v2535_v42 = vpop.permute.xlu1 %2534 }
0x1901   :  { %v2053_v60 = vsel %vm2050_vm10, %v2052_v15, %v2048_v17  ;;  %2086 = vmatpush.msra.mxu2 %v2066_v58  ;;  %vm2253_vm14 = vmor %vm2251_vm13, %vm2252_vm12  ;;  %v2536_v45 = vunpack.i.l.bf16 %v2535_v42 }
0x1902   :  { %v2248_v40 = vsub.f32 1.0, %v2247_v18  ;;  %2494 = vmatmul.msk.f32.vlgmr.msra.gmra.mxu2 %vm1524_vm0, %v2039_v11  ;;  %v2054_v63 = vmul.f32 %v3421_v20, %v2053_v60 }
0x1903   :  { %2292 = vmatpush.msrb.mxu2 %v2272_v62  ;;  %v2100_v32 = vpop.permute.xlu0 %2099  ;;  %2400 = vmatpush.msra.mxu0 %v2536_v45 }
0x1904   :  { %v2249_v3 = vmul.f32 %v2702_v52, %v2248_v40  ;;  %2120 = vmatpush.msrb.mxu3 %v2100_v32  ;;  %v2056_v21 = vadd.f32 %v2054_v63, %v1850_v19 }
0x1905   :  { %2495 = vmatmul.msk.f32.vlgmr.msrb.gmra.mxu3 %vm1524_vm0, %v2054_v63 }
0x1906   :  { %v2250_v24 = vadd.f32 %v2702_v52, %v2249_v3 }
0x1908   :  { %v2254_v20 = vsel %vm2253_vm14, %v2702_v52, %v2250_v24 }
0x1909   :  { %v2259_v26 = vsel %vm2256_vm2, %v2258_v25, %v2254_v20 }
0x190a   :  { %v1882_v31 = vpop.f32.mrf.mxu2  ;;  %2500 = vmatmul.msk.f32.vlgmr.msrb.gmra.mxu2 %vm1524_vm0, %v2245_v7  ;;  %v2260_v5 = vmul.f32 %v3425_v50, %v2259_v26  ;;  %v2055_v50 = vadd.f32 %v2039_v11, %v1849_v56 }
0x190b   :  { %2333 = vrot.lane.b32.xlu2 %v1882_v31, %s2786_s21  ;;  %v2306_v33 = vpop.permute.xlu0 %2305 }
0x190c   :  { %2326 = vmatpush.msra.mxu3 %v2306_v33  ;;  %v2262_v35 = vadd.f32 %v2260_v5, %v2056_v21  ;;  %v2261_v36 = vadd.f32 %v2245_v7, %v2055_v50 }
0x190d   :  { %2501 = vmatmul.msk.f32.vlgmr.msra.gmra.mxu3 %vm1524_vm0, %v2260_v5 }
0x190e   :  { %v2411_v22 = vmul.f32 0.25, %v2261_v36  ;;  %v2412_v48 = vmul.f32 0.25, %v2262_v35 }
0x1913   :  { %v2540_v4 = vpop.permute.xlu0 %2539 }
0x1914   :  { %v2541_v54 = vunpack.i.l.bf16 %v2540_v4  ;;  %v2542_v57 = vunpack.i.h.bf16 %v2540_v4 }
0x191d   :  { %v1710_v23 = vpop.f32.mrf.mxu3 }
0x1965   :  { %v2334_v10 = vpop.permute.xlu2 %2333 }
0x1966   :  { %v2355_v12 = vsel %vm1524_vm0, %v3386_v16, %v2334_v10 }
0x197f   :  { %v1916_v13 = vpop.f32.mrf.mxu3 }
0x1980   :  { %2335 = vrot.lane.b32.xlu0 %v1916_v13, %s2786_s21 }
0x1985   :  { %v2088_v28 = vpop.f32.mrf.mxu2 }
0x1986   :  { %2341 = vrot.lane.b32.xlu1 %v2088_v28, %s2804_s11 }
0x1988   :  { %2379 = vrot.lane.b32.xlu0 %v3183_v0, %s2792_s0  ;;  %v2122_v41 = vpop.f32.mrf.mxu3  ;;  %v2537_v0 = vunpack.i.h.bf16 %v2535_v42 }
0x198a   :  { %2401 = vmatpush.msra.mxu0 %v2537_v0 }
0x198c   :  { %2402 = vmatpush.msra.mxu0 %v2541_v54 }
0x198d   :  { %v2294_v6 = vpop.f32.mrf.mxu2 }
0x198e   :  { %2343 = vrot.lane.b32.xlu1 %v2122_v41, %s2804_s11  ;;  %2349 = vrot.lane.b32.xlu2 %v2294_v6, %s2805_s12 }
0x198f   :  { %2403 = vmatpush.msra.mxu0 %v2542_v57 }
0x1990   :  { %v2328_v14 = vpop.f32.mrf.mxu3 }
0x1996   :  { %2415 = vrot.lane.b32.xlu1 %v2411_v22, %s2792_s0  ;;  %2351 = vrot.lane.b32.xlu2 %v2328_v14, %s2805_s12 }
0x199e   :  { %2417 = vrot.lane.b32.xlu2 %v2412_v48, %s2792_s0 }
0x19e8   :  { %v2350_v9 = vpop.permute.xlu2 %2349 }
0x19f0   :  { %v2352_v34 = vpop.permute.xlu2 %2351 }
0x19f2   :  { %v2336_v47 = vpop.permute.xlu0 %2335 }
0x19f3   :  { %v2356_v43 = vsel %vm1524_vm0, %v1710_v23, %v2336_v47 }
0x19f8   :  { %v2342_v37 = vpop.permute.xlu1 %2341  ;;  %v2418_v15 = vpop.permute.xlu2 %2417 }
0x19f9   :  { %v2357_v27 = vsel %vm159_vm1, %v2355_v12, %v2342_v37 }
0x19fa   :  { %v2360_v46 = vsel %vm2359_vm3, %v2357_v27, %v2350_v9  ;;  %v2380_v30 = vpop.permute.xlu0 %2379 }
0x19fb   :  { %2502 = vmatmul.msk.f32.vlgmr.msra.gmra.mxu0 %vm187_vm6, %v2360_v46 }
0x1a00   :  { %v2344_v38 = vpop.permute.xlu1 %2343 }
0x1a01   :  { %v2358_v51 = vsel %vm159_vm1, %v2356_v43, %v2344_v38 }
0x1a02   :  { %v2361_v53 = vsel %vm2359_vm3, %v2358_v51, %v2352_v34 }
0x1a03   :  { %2503 = vmatmul.msk.f32.gmra.mxu0 %vm187_vm6, %v2361_v53 }
0x1a08   :  { %v2416_v16 = vpop.permute.xlu1 %2415 }
0x1a78   :  { %v2405_v44 = vpop.f32.mrf.mxu0 }
0x1a79   :  { %v2406_v49 = vadd.f32 %v2405_v44, %v2380_v30 }
0x1a7b   :  { %v2421_v52 = vsel %vm187_vm6, %v2406_v49, %v2416_v16 }
0x1a7c   :  { %2424 = vst.msk [vmem:[%s3501_s3] sm:$0xff] %vm2423_vm7, %v2421_v52 }
0x1a80   :  { %v2408_v39 = vpop.f32.mrf.mxu0 }
0x1a81   :  { %v2409_v55 = vadd.f32 %v2408_v39, %v2380_v30 }
0x1a83   :  { %v2422_v17 = vsel %vm187_vm6, %v2409_v55, %v2418_v15 }
0x1a84   :  { %2425 = vst.msk [vmem:[%s3501_s3 + $0x8] sm:$0xff] %vm2423_vm7, %v2422_v17 }
0x1a85   :  { %2430 = vsyncpa [#allocation3], 1 }
0x1a86   :  { %2431 = vsyncpa [#allocation5], 1 }

</bundles_post_ra>
